<compile_context>
chip_gen: v7x
topology: tpu7x:2x2x1
jax: 0.10.0
libtpu: 0.0.40
codegen_flags: <defaults>
</compile_context>

<pallas_src>
import functools

import jax
import jax.numpy as jnp
from jax.experimental import pallas as pl
from jax.experimental.pallas import tpu as pltpu


def _ffn_kernel(x_ref, w13_ref, w2_ref, o_ref, g_ref, acc_ref):
    """Fused SwiGLU FFN tile step.

    Grid = (M tiles i, hidden tiles j, input-dim tiles k); k (contraction over
    D) is innermost.  g accumulates  x @ [w1_j || w3_j]  over k in f32.  When k
    finishes, the SiLU gate is formed in f32 and  gate @ w2_j  is accumulated
    into `acc` over j; the (tm, D) output tile is written once at the end.
    """
    j = pl.program_id(1)          # hidden-dim tile index
    k = pl.program_id(2)          # input-dim (contraction) tile index
    nj = pl.num_programs(1)
    nk = pl.num_programs(2)
    tk = w13_ref.shape[0]
    th = w13_ref.shape[1] // 2

    @pl.when(k == 0)
    def _():
        g_ref[...] = jnp.zeros_like(g_ref)

    # x is resident in VMEM as a (tm, D) block; slice out this step's k-chunk.
    x = x_ref[:, pl.ds(pl.multiple_of(k * tk, tk), tk)]          # bf16 (tm, tk)
    # Single fused dot: [x@w1_j || x@w3_j] accumulated in f32.
    g_ref[...] += jnp.dot(x, w13_ref[...], preferred_element_type=jnp.float32)

    @pl.when((k == nk - 1) & (j == 0))
    def _():
        acc_ref[...] = jnp.zeros_like(acc_ref)

    @pl.when(k == nk - 1)
    def _():
        g1 = g_ref[:, :th]                                       # f32 (tm, th)
        g3 = g_ref[:, th:]                                       # f32 (tm, th)
        gate = (g1 * jax.nn.sigmoid(g1)) * g3                    # SiLU gate, f32
        acc_ref[...] += jnp.dot(gate.astype(w2_ref.dtype), w2_ref[...],
                                preferred_element_type=jnp.float32)

    @pl.when((k == nk - 1) & (j == nj - 1))
    def _():
        o_ref[...] = acc_ref[...].astype(o_ref.dtype)


def prepare_weights(w1, w3, w2, *, th):
    """One-time (outside the serving loop) weight prep.

    Casts to bf16 and fuses w1/w3 into a single [D, 2H] matrix whose column
    tile j holds  w1[:, j*th:(j+1)*th] || w3[:, j*th:(j+1)*th], so the kernel
    can grab both gate weights for a hidden tile with one BlockSpec fetch and
    one MXU dot.  `th` must match the th passed to feed_forward.
    """
    D, H = w1.shape
    assert w3.shape == (D, H) and w2.shape == (H, D)
    assert H % th == 0, (H, th)
    nj = H // th
    w1b = w1.astype(jnp.bfloat16).reshape(D, nj, th)
    w3b = w3.astype(jnp.bfloat16).reshape(D, nj, th)
    w13 = jnp.concatenate([w1b, w3b], axis=2).reshape(D, 2 * H)
    return w13, w2.astype(jnp.bfloat16)


@functools.partial(jax.jit, static_argnames=("tm", "th", "tk"))
def feed_forward(x, w13, w2, *, tm=512, th=512, tk=1024):
    """x: [M, D]; w13: [D, 2H] (interleaved, bf16); w2: [H, D] bf16 -> [M, D] bf16.

    Per-generation tuning hints (tm is the arithmetic-intensity knob):
      v5e: tm >= 256, v7x: tm ~ 384-512 (64 MiB VMEM), v6e: tm >= 512.
    """
    M, D = x.shape
    H = w2.shape[0]
    assert w13.shape == (D, 2 * H)
    assert w13.dtype == jnp.bfloat16 and w2.dtype == jnp.bfloat16, \
        "prepare weights once with prepare_weights(); don't cast per call"

    tm = min(tm, M)
    th = min(th, H)
    tk = min(tk, D)
    # v7x has 2 TensorCores and only the i axis is "parallel": make sure there
    # are at least 2 i-tiles when M is large enough to split.
    if tm == M and M >= 256 and (M // 2) % 8 == 0:
        tm = M // 2
    assert M % tm == 0 and H % th == 0 and D % tk == 0, (M, H, D, tm, th, tk)
    assert D % 128 == 0 and th % 128 == 0 and tk % 128 == 0 and tm % 8 == 0, \
        "lane/sublane alignment (D, th, tk multiples of 128; tm multiple of 8)"
    # TODO(synk): ragged M/H/D (padding/masking path) not implemented.

    x = x.astype(jnp.bfloat16)   # activation cast is cheap vs. weight stream

    grid = (M // tm, H // th, D // tk)

    # VMEM footprint: inputs/outputs double-buffered + f32 scratch, + headroom.
    vmem_bytes = (
        2 * tm * D * 2            # x (bf16), double-buffered
        + 2 * tk * (2 * th) * 2   # fused w13 (bf16), double-buffered
        + 2 * th * D * 2          # w2 (bf16), double-buffered
        + 2 * tm * D * 2          # output (bf16), double-buffered
        + tm * (2 * th) * 4       # g accumulator scratch (f32)
        + tm * D * 4              # output accumulator scratch (f32)
    )
    vmem_limit = min(max(int(vmem_bytes * 1.25) + (4 << 20), 32 << 20), 96 << 20)

    return pl.pallas_call(
        _ffn_kernel,
        out_shape=jax.ShapeDtypeStruct((M, D), jnp.bfloat16),
        grid_spec=pltpu.PrefetchScalarGridSpec(
            num_scalar_prefetch=0,
            grid=grid,
            in_specs=[
                # x: resident across the whole (j, k) sweep for a given i.
                pl.BlockSpec((tm, D), lambda i, j, k: (i, 0)),
                # fused w1||w3 tile for hidden tile j, contraction tile k.
                pl.BlockSpec((tk, 2 * th), lambda i, j, k: (k, j)),
                # w2 tile for hidden tile j (full lane-dense D output width).
                pl.BlockSpec((th, D), lambda i, j, k: (j, 0)),
            ],
            out_specs=pl.BlockSpec((tm, D), lambda i, j, k: (i, 0)),
            scratch_shapes=[
                pltpu.VMEM((tm, 2 * th), jnp.float32),  # [x@w1 || x@w3] accumulator
                pltpu.VMEM((tm, D), jnp.float32),       # output accumulator
            ],
        ),
        compiler_params=pltpu.CompilerParams(
            dimension_semantics=("parallel", "arbitrary", "arbitrary"),
            vmem_limit_bytes=vmem_limit,
        ),
    )(x, w13, w2)


if __name__ == "__main__":
    # Small ModelArgs-consistent config:
    #   dim=512, multiple_of=256 -> hidden_dim = 256 * ceil(int(2*512/3)/256) = 512
    #   batch=2, seq=64 -> M = 128 rows.
    dim = 512
    multiple_of = 256
    hidden_dim = int(2 * dim / 3)
    hidden_dim = multiple_of * ((hidden_dim + multiple_of - 1) // multiple_of)
    batch, seq = 2, 64

    key = jax.random.PRNGKey(0)
    kx, k1, k2, k3 = jax.random.split(key, 4)
    x = jax.random.normal(kx, (batch, seq, dim), jnp.float32)
    # nn.Linear weights stored transposed ([in, out]) so the kernel does x @ W.
    w1 = 0.02 * jax.random.normal(k1, (dim, hidden_dim), jnp.float32)
    w3 = 0.02 * jax.random.normal(k3, (dim, hidden_dim), jnp.float32)
    w2 = 0.02 * jax.random.normal(k2, (hidden_dim, dim), jnp.float32)

    # Tile sizes chosen to exercise all three grid axes at these small shapes
    # (grid = (2, 2, 2)); at real model sizes the defaults (512/512/1024) apply.
    tm, th, tk = 64, 256, 256

    # One-time weight prep (cast + fuse) outside the serving loop.
    w13_b, w2_b = prepare_weights(w1, w3, w2, th=th)
    w13_b = jax.block_until_ready(w13_b)

    out = feed_forward(x.reshape(batch * seq, dim), w13_b, w2_b,
                       tm=tm, th=th, tk=tk)
    out = jax.block_until_ready(out).reshape(batch, seq, dim)

    # Reference with the same bf16 matmul inputs + f32 accumulation.
    xb = x.reshape(batch * seq, dim).astype(jnp.bfloat16)
    h1 = jnp.dot(xb, w1.astype(jnp.bfloat16), preferred_element_type=jnp.float32)
    h3 = jnp.dot(xb, w3.astype(jnp.bfloat16), preferred_element_type=jnp.float32)
    gate = (h1 * jax.nn.sigmoid(h1)) * h3
    ref = jnp.dot(gate.astype(jnp.bfloat16), w2.astype(jnp.bfloat16),
                  preferred_element_type=jnp.float32).reshape(batch, seq, dim)

    assert out.shape == (batch, seq, dim) and out.dtype == jnp.bfloat16
    out_f32 = out.astype(jnp.float32)
    max_err = float(jnp.max(jnp.abs(out_f32 - ref)))
    assert jnp.allclose(out_f32, ref, rtol=2e-2, atol=2e-2), max_err
    print("KERNEL_OK")
</pallas_src>

<mosaic_0001>
module attributes {stable_mosaic.version = 11 : i64} {
  func.func @_ffn_kernel(%arg0: i32, %arg1: i32, %arg2: i32, %arg3: memref<64x512xbf16, #tpu.memory_space<vmem>>, %arg4: memref<256x512xbf16, #tpu.memory_space<vmem>>, %arg5: memref<256x512xbf16, #tpu.memory_space<vmem>>, %arg6: memref<64x512xbf16, #tpu.memory_space<vmem>>, %arg7: memref<64x512xf32, #tpu.memory_space<vmem>>, %arg8: memref<64x512xf32, #tpu.memory_space<vmem>>) attributes {dimension_semantics = [#tpu.dimension_semantics<parallel>, #tpu.dimension_semantics<arbitrary>, #tpu.dimension_semantics<arbitrary>], iteration_bounds = array<i64: 2, 2, 2>, scalar_prefetch = 0 : i64, scratch_operands = 2 : i64, tpu.core_type = #tpu.core_type<tc>, window_params = [{transform_indices = @transform_0, window_bounds = array<i64: 64, 512>}, {transform_indices = @transform_1, window_bounds = array<i64: 256, 512>}, {transform_indices = @transform_2, window_bounds = array<i64: 256, 512>}, {transform_indices = @transform_3, window_bounds = array<i64: 64, 512>}]} {
    %c0_i32 = arith.constant 0 : i32
    %0 = arith.cmpi eq, %arg2, %c0_i32 : i32
    %1 = arith.extui %0 : i1 to i32
    %c0_i32_0 = arith.constant 0 : i32
    %2 = arith.cmpi ne, %1, %c0_i32_0 : i32
    scf.if %2 {
      %cst_14 = arith.constant 0.000000e+00 : f32
      %25 = vector.broadcast %cst_14 : f32 to vector<64x512xf32>
      %c0_15 = arith.constant 0 : index
      %c0_16 = arith.constant 0 : index
      %26 = vector.load %arg7[%c0_15, %c0_16] : memref<64x512xf32, #tpu.memory_space<vmem>>, vector<64x512xf32>
      tpu.vector_store %arg7[%c0_15, %c0_16], %25 {strides = array<i32>} : memref<64x512xf32, #tpu.memory_space<vmem>>, vector<64x512xf32>,
    } else {
    }
    %c256_i32 = arith.constant 256 : i32
    %3 = arith.muli %arg2, %c256_i32 : i32
    %4 = tpu.assume_multiple %3, 256 : i32
    %c0 = arith.constant 0 : index
    %5 = arith.index_cast %4 : i32 to index
    %6 = vector.load %arg3[%c0, %5] : memref<64x512xbf16, #tpu.memory_space<vmem>>, vector<64x256xbf16>
    %c0_1 = arith.constant 0 : index
    %c0_2 = arith.constant 0 : index
    %7 = vector.load %arg7[%c0_1, %c0_2] : memref<64x512xf32, #tpu.memory_space<vmem>>, vector<64x512xf32>
    %c0_3 = arith.constant 0 : index
    %c0_4 = arith.constant 0 : index
    %8 = vector.load %arg4[%c0_3, %c0_4] : memref<256x512xbf16, #tpu.memory_space<vmem>>, vector<256x512xbf16>
    %cst = arith.constant dense<0.000000e+00> : vector<64x512xf32>
    %9 = tpu.matmul %6, %8, %cst {dimension_numbers = #tpu.dot_dimension_numbers<[1], [0], [0], [1], [0, 0, 1, 1], [], []>} : vector<64x256xbf16>, vector<256x512xbf16>, vector<64x512xf32> -> vector<64x512xf32>
    %10 = arith.addf %7, %9 : vector<64x512xf32>
    %c0_5 = arith.constant 0 : index
    %c0_6 = arith.constant 0 : index
    %11 = vector.load %arg7[%c0_5, %c0_6] : memref<64x512xf32, #tpu.memory_space<vmem>>, vector<64x512xf32>
    tpu.vector_store %arg7[%c0_5, %c0_6], %10 {strides = array<i32>} : memref<64x512xf32, #tpu.memory_space<vmem>>, vector<64x512xf32>,
    %c1_i32 = arith.constant 1 : i32
    %12 = arith.cmpi eq, %arg2, %c1_i32 : i32
    %c0_i32_7 = arith.constant 0 : i32
    %13 = arith.cmpi eq, %arg1, %c0_i32_7 : i32
    %14 = arith.andi %12, %13 : i1
    %15 = arith.extui %14 : i1 to i32
    %c0_i32_8 = arith.constant 0 : i32
    %16 = arith.cmpi ne, %15, %c0_i32_8 : i32
    scf.if %16 {
      %cst_14 = arith.constant 0.000000e+00 : f32
      %25 = vector.broadcast %cst_14 : f32 to vector<64x512xf32>
      %c0_15 = arith.constant 0 : index
      %c0_16 = arith.constant 0 : index
      %26 = vector.load %arg8[%c0_15, %c0_16] : memref<64x512xf32, #tpu.memory_space<vmem>>, vector<64x512xf32>
      tpu.vector_store %arg8[%c0_15, %c0_16], %25 {strides = array<i32>} : memref<64x512xf32, #tpu.memory_space<vmem>>, vector<64x512xf32>,
    } else {
    }
    %c1_i32_9 = arith.constant 1 : i32
    %17 = arith.cmpi eq, %arg2, %c1_i32_9 : i32
    %18 = arith.extui %17 : i1 to i32
    %c0_i32_10 = arith.constant 0 : i32
    %19 = arith.cmpi ne, %18, %c0_i32_10 : i32
    scf.if %19 {
      %c0_14 = arith.constant 0 : index
      %c0_15 = arith.constant 0 : index
      %25 = vector.load %arg7[%c0_14, %c0_15] : memref<64x512xf32, #tpu.memory_space<vmem>>, vector<64x256xf32>
      %c0_16 = arith.constant 0 : index
      %c256 = arith.constant 256 : index
      %26 = vector.load %arg7[%c0_16, %c256] : memref<64x512xf32, #tpu.memory_space<vmem>>, vector<64x256xf32>
      %27 = arith.negf %25 : vector<64x256xf32>
      %28 = math.exp %27 : vector<64x256xf32>
      %cst_17 = arith.constant 1.000000e+00 : f32
      %29 = vector.broadcast %cst_17 : f32 to vector<64x256xf32>
      %30 = arith.addf %29, %28 : vector<64x256xf32>
      %31 = arith.divf %29, %30 : vector<64x256xf32>
      %32 = arith.mulf %25, %31 : vector<64x256xf32>
      %33 = arith.mulf %32, %26 : vector<64x256xf32>
      %c0_18 = arith.constant 0 : index
      %c0_19 = arith.constant 0 : index
      %34 = vector.load %arg8[%c0_18, %c0_19] : memref<64x512xf32, #tpu.memory_space<vmem>>, vector<64x512xf32>
      %35 = arith.truncf %33 : vector<64x256xf32> to vector<64x256xbf16>
      %c0_20 = arith.constant 0 : index
      %c0_21 = arith.constant 0 : index
      %36 = vector.load %arg5[%c0_20, %c0_21] : memref<256x512xbf16, #tpu.memory_space<vmem>>, vector<256x512xbf16>
      %cst_22 = arith.constant dense<0.000000e+00> : vector<64x512xf32>
      %37 = tpu.matmul %35, %36, %cst_22 {dimension_numbers = #tpu.dot_dimension_numbers<[1], [0], [0], [1], [0, 0, 1, 1], [], []>} : vector<64x256xbf16>, vector<256x512xbf16>, vector<64x512xf32> -> vector<64x512xf32>
      %38 = arith.addf %34, %37 : vector<64x512xf32>
      %c0_23 = arith.constant 0 : index
      %c0_24 = arith.constant 0 : index
      %39 = vector.load %arg8[%c0_23, %c0_24] : memref<64x512xf32, #tpu.memory_space<vmem>>, vector<64x512xf32>
      tpu.vector_store %arg8[%c0_23, %c0_24], %38 {strides = array<i32>} : memref<64x512xf32, #tpu.memory_space<vmem>>, vector<64x512xf32>,
    } else {
    }
    %c1_i32_11 = arith.constant 1 : i32
    %20 = arith.cmpi eq, %arg2, %c1_i32_11 : i32
    %c1_i32_12 = arith.constant 1 : i32
    %21 = arith.cmpi eq, %arg1, %c1_i32_12 : i32
    %22 = arith.andi %20, %21 : i1
    %23 = arith.extui %22 : i1 to i32
    %c0_i32_13 = arith.constant 0 : i32
    %24 = arith.cmpi ne, %23, %c0_i32_13 : i32
    scf.if %24 {
      %c0_14 = arith.constant 0 : index
      %c0_15 = arith.constant 0 : index
      %25 = vector.load %arg8[%c0_14, %c0_15] : memref<64x512xf32, #tpu.memory_space<vmem>>, vector<64x512xf32>
      %26 = arith.truncf %25 : vector<64x512xf32> to vector<64x512xbf16>
      %c0_16 = arith.constant 0 : index
      %c0_17 = arith.constant 0 : index
      %27 = vector.load %arg6[%c0_16, %c0_17] : memref<64x512xbf16, #tpu.memory_space<vmem>>, vector<64x512xbf16>
      tpu.vector_store %arg6[%c0_16, %c0_17], %26 {strides = array<i32>} : memref<64x512xbf16, #tpu.memory_space<vmem>>, vector<64x512xbf16>,
    } else {
    }
    return
  }
  func.func @transform_0(%arg0: i32, %arg1: i32, %arg2: i32) -> (i32, i32) {
    %c0_i32 = arith.constant 0 : i32
    %c0_i32_0 = arith.constant 0 : i32
    return %arg0, %c0_i32 : i32, i32
  }
  func.func @transform_1(%arg0: i32, %arg1: i32, %arg2: i32) -> (i32, i32) {
    %c0_i32 = arith.constant 0 : i32
    return %arg2, %arg1 : i32, i32
  }
  func.func @transform_2(%arg0: i32, %arg1: i32, %arg2: i32) -> (i32, i32) {
    %c0_i32 = arith.constant 0 : i32
    %c0_i32_0 = arith.constant 0 : i32
    return %arg1, %c0_i32 : i32, i32
  }
  func.func @transform_3(%arg0: i32, %arg1: i32, %arg2: i32) -> (i32, i32) {
    %c0_i32 = arith.constant 0 : i32
    %c0_i32_0 = arith.constant 0 : i32
    return %arg0, %c0_i32 : i32, i32
  }
}

</mosaic_0001>

<bundles_post_ra>
// kernel: feed_forward.1
= control target key start
LH: loop header
LB: loop body
LE: loop exit
PB: predicated region body
PF: predicated region fallthrough
CT: control target
= control target key end

     0   :  { %s3652_s0 = inlined_call_operand.vmem [shape: bf16[128,512], index: 0, kind: input, shape index: {}]   ;;  %s3653_s1 = inlined_call_operand.hbm [shape: bf16[512,1024], index: 1, kind: input, shape index: {}]   ;;  %s3654_s2 = inlined_call_operand.hbm [shape: bf16[512,512], index: 2, kind: input, shape index: {}]   ;;  %s3655_s3 = inlined_call_operand.hbm [shape: bf16[128,512], index: 3, kind: output, shape index: {}]  }
   0x1   :  { %3670 = sst [smem:[#allocation19_spill]] %s3652_s0 }
   0x2   :  { %3671 = sst [smem:[#allocation20_spill]] %s3653_s1 }
   0x3   :  { %3672 = sst [smem:[#allocation21_spill]] %s3654_s2 }
   0x4   :  { %3673 = sst [smem:[#allocation22_spill]] %s3655_s3 }
   0x5   :  { %8 = vsyncpa [#allocation5], 0 }
   0x6   :  { %10 = vsyncpa [#allocation5 + $0x1], 0 }
   0x7   :  { %11 = vsyncpa [#allocation8], 0 }
   0x8   :  { %13 = vsyncpa [#allocation8 + $0x1], 0 }
   0x9   :  { %14 = vsyncpa [#allocation6], 0 }
   0xa   :  { %16 = vsyncpa [#allocation6 + $0x1], 0  ;;  %s3027_s12 = smov 0   ;;  %s3029_s13 = smov 0  }
   0xb   :  { %s3031_s14 = smov 0   ;;  %s3033_s15 = smov 0  }
   0xc   :  { %s3035_s16 = smov 0   ;;  %s3037_s17 = smov 0  }
   0xd   :  { %s3039_s18 = smov 0   ;;  %s3041_s19 = smov 0  }
   0xe   :  { %s3043_s20 = smov 0   ;;  %s3045_s21 = smov 0  }
   0xf   :  { %s3047_s22 = smov 0   ;;  %s3049_s23 = smov 0  }
  0x10   :  { %s3051_s24 = smov 0   ;;  %s3053_s25 = smov 0  }
  0x11   :  { %s3055_s26 = smov 0   ;;  %s3057_s27 = smov 0  }
  0x12 LB: > { %3674 = sst [smem:[#allocation13_spill]] %s2971_s21  ;;  %s34_s28 = sadd.s32 1, %s2983_s24  ;;  %s2995_s27 = sphi %s3057_s27, %s22_s27   ;;  %s2991_s26 = sphi %s3055_s26, %s3731_s26   ;;  %s2987_s25 = sphi %s3053_s25, %s3730_s25   ;;  %s2983_s24 = sphi %s3051_s24, %s3729_s24   ;;  %s2979_s23 = sphi %s3049_s23, %s3728_s23   ;;  %s2975_s22 = sphi %s3047_s22, %s3727_s22   ;;  %s2971_s21 = sphi %s3045_s21, %s3726_s21   ;;  %s2967_s20 = sphi %s3043_s20, %s3725_s20   ;;  %s2963_s19 = sphi %s3041_s19, %s3724_s19   ;;  %s2959_s18 = sphi %s3039_s18, %s3723_s18   ;;  %s2955_s17 = sphi %s3037_s17, %s3722_s17   ;;  %s2951_s16 = sphi %s3035_s16, %s3721_s16   ;;  %s2947_s15 = sphi %s3033_s15, %s3720_s15   ;;  %s2943_s14 = sphi %s3031_s14, %s3719_s14   ;;  %s2939_s13 = sphi %s3029_s13, %s3718_s13   ;;  %s2935_s12 = sphi %s3027_s12, %s3717_s12  }
  0x13   : > { %3675 = sst [smem:[#allocation14_spill]] %s2975_s22  ;;  %s37_s29 = sadd.s32 1, %s2987_s25 }
  0x14   : > { %3676 = sst [smem:[#allocation15_spill]] %s2979_s23  ;;  %p35_p0 = scmp.ge.s32.totalorder %s34_s28, 2 }
  0x15   : > { %s41_s30 = sadd.s32 1, %s2991_s26  ;;  %s76_s4 = sadd.s32 1, %s2967_s20 }
  0x16   : > { %p83_p1 = scmp.ne.s32.totalorder %s2967_s20, %s2963_s19  ;;  %s3733_s28 = smov (%p35_p0, %s34_s28), 0 }
  0x17   : > { %3677 = sst [smem:[#allocation16_spill]] %s3733_s28  ;;  %s3735_s29 = smov (!%p35_p0, %s37_s29), %s2987_s25 }
  0x18   : > { %s71_s5 = ssub.s32 %s2983_s24, %s3733_s28  ;;  %p3662_p2 = scmp.eq.s32.totalorder %s2995_s27, 0 }
  0x19   : > { %p39_p3 = scmp.ge.s32.totalorder %s3735_s29, 2  ;;  %p3661_p6 = scmp.lt.s32.totalorder %s2995_s27, 8 }
  0x1a   : > { %p3123_p5 = por %p3662_p2, %p83_p1  ;;  %s175_s11 = sand.u32 1, %s2967_s20  }
  0x1b   : > { %s3737_s29 = smov (%p39_p3, %s3735_s29), 0  ;;  %s3739_s30 = smov (!%p39_p3, %s41_s30), %s2991_s26 }
  0x1c   : > { %3679 = sst [smem:[#allocation17_spill]] %s3737_s29  ;;  %s3132_s7 = ssub.s32 %s2987_s25, %s3737_s29 }
  0x1d   : > { %p43_p7 = scmp.ge.s32.totalorder %s3739_s30, 2  ;;  %s73_s8 = sor.u32 %s3132_s7, %s71_s5 }
  0x1e   : > { %p74_p8 = scmp.eq.s32.totalorder %s73_s8, 0  ;;  %s2131_s29 = sshll.u32 %s175_s11, 9 }
  0x1f   : > { %s3741_s30 = smov (%p43_p7, %s3739_s30), 0  ;;  %s2133_s3 = sshll.u32 %s2987_s25, 2 }
  0x20   : > { %3680 = sst [smem:[#allocation18_spill]] %s3741_s30  ;;  %s125_s10 = ssub.s32 %s2991_s26, %s3741_s30 }
  0x21   : > { %s3140_s9 = scalar_select %p74_p8, %s2967_s20, %s76_s4  }
  0x22   : > { %p3145_p10 = scmp.eq.s32.totalorder %s125_s10, 0  ;;  %s2325_s22 = sshll.u32 %s2983_s24, 8 }
  0x23   : > { %s186_s21 = sadd.s32 %s2325_s22, %s2133_s3  ;;  %s179_s5 = scalar_lea.vmem [#allocation4], %s2131_s29 }
  0x24   : > { %s189_s8 = sshll.u32 %s179_s5, 4  ;;  %s2135_s0 = sshll.u32 %s186_s21, 6  ;;  %s3151_s8 = int_to_ptr.vmem [resolvable:$true] %s189_s8 }
  0x25   : > { %s3682_s1 = sld [smem:[#allocation20_spill]]  ;;  %p3162_p11 = pnand %p3661_p6, %p3123_p5 }
  0x26   : > { %s3166_s3 = scalar_lea.sflag [#allocation5], %s175_s11 }
  0x27   : > { %p2771_p13 = pneg %p3162_p11 }
  0x2b   : > { %s3156_s4 = scalar_lea.hbm %s3682_s1, %s2135_s0  ;;  %s2774_s22 = scalar_lea.hbm %s3682_s1, 32768 }
  0x2c   : > { %s2769_s21 = scalar_lea.hbm %s3156_s4, 8192  ;;  %p2775_p3 = scmp.lt.u32.totalorder %s3156_s4, %s3682_s1 }
  0x2d   : > { %p2770_p12 = scmp.ne.s32.totalorder %s3156_s4, %s2769_s21  ;;  %p2776_p5 = scmp.lt.u32.totalorder %s2774_s22, %s2769_s21 }
  0x2e   : > { %p2778_p8 = scmp.lt.u32.totalorder %s2769_s21, %s3156_s4 }
  0x2f   : > { %p2772_p0 = pnand %p2771_p13, %p2770_p12  ;;  %p2777_p7 = por %p2776_p5, %p2775_p3 }
  0x31   : > { %p2773_p1 = pneg %p2772_p0  ;;  %p2779_p6 = por %p2778_p8, %p2777_p7 }
  0x33   : > { %p2780_p2 = pnand %p2779_p6, %p2773_p1 }
  0x35   : > { %2783 = shalt.err (!%p2780_p2)
}
  0x36   : > { %s2784_s6 = scalar_lea.vmem %s3151_s8, 8192  ;;  %s2997_s11 = smov [#allocation4]  }
  0x37   : > { %p2785_p12 = scmp.ne.s32.totalorder %s3151_s8, %s2784_s6  ;;  %s2789_s5 = sshll.u32 %s2997_s11, 4  ;;  %s2790_s5 = int_to_ptr.vmem [resolvable:$false] %s2789_s5 }
  0x38   : > { %s2791_s0 = scalar_lea.vmem %s2790_s5, 16384  ;;  %p2792_p4 = scmp.lt.s32.totalorder %s3151_s8, %s2790_s5 }
  0x39   : > { %p2787_p0 = pnand %p2785_p12, %p2771_p13  ;;  %p2793_p3 = scmp.lt.s32.totalorder %s2791_s0, %s2784_s6 }
  0x3b   : > { %p2788_p9 = pneg %p2787_p0  ;;  %p2794_p5 = por %p2793_p3, %p2792_p4 }
  0x3d   : > { %p2795_p7 = pnand %p2794_p5, %p2788_p9 }
  0x3f   : > { %2798 = shalt.err (!%p2795_p7)
}
  0x40   : > { %s2998_s21 = smov 512   ;;  %s3663_s2 = smov 256  }
  0x41   : > { %s3664_s22 = smov 16   ;;  %p2140_p2 = scmp.ge.s32.totalorder %s2995_s27, 1 }
  0x42   : > { %2356 = dma.hbm_to_vmem [thread:$0]  (!%p3162_p11), %s3156_s4, 8192, %s3151_s8, %s3166_s3, %s2998_s21, %s3663_s2, %s3664_s22  }
  0x43   : > { %p219_p4 = scmp.lt.s32.totalorder %s2995_s27, 9  ;;  %s2127_s29 = sadd.s32 4294967295, %s2995_s27  }
  0x44   : > { %s2128_s6 = sadd.s32 4294967294, %s2995_s27   ;;  %p90_p9 = scmp.eq.s32.totalorder %s2127_s29, 0 }
  0x45   : > { %p3198_p6 = pnand %p2140_p2, %p219_p4  ;;  %s102_s10 = sadd.s32 1, %s2955_s17 }
  0x46   : > { %p109_p13 = scmp.ne.s32.totalorder %s2955_s17, %s2951_s16  ;;  %p3685_p1 = scmp.ne.s32.totalorder %s2963_s19, %s2959_s18 }
  0x47   : > { %p115_p11 = scmp.ne.s32.totalorder %s2951_s16, %s2947_s15  ;;  %p3687_p12 = scmp.eq.s32.totalorder %s3132_s7, 0 }
  0x48   : > { %p3210_p8 = por %p90_p9, %p3685_p1  ;;  %p3688_p0 = scmp.eq.s32.totalorder %s2995_s27, 0 }
  0x49   : > { %s3219_s4 = scalar_select %p3687_p12, %s2955_s17, %s102_s10  }
  0x4a   : > { %s3686_s8 = scalar_select %p3210_p8, 1, 0 }
  0x4b   : > { %p3223_p3 = por %p109_p13, %p3688_p0  ;;  %p3227_p5 = por %p115_p11, %p90_p9 }
  0x4c   : > { %s128_s18 = sadd.s32 1, %s2943_s14  ;;  %p138_p7 = scmp.ne.s32.totalorder %s2943_s14, %s2939_s13 }
  0x4d   : > { %s3690_s11 = scalar_select %p3227_p5, 1, 0 }
  0x4e   : > { %s3237_s5 = scalar_select %p3145_p10, %s2943_s14, %s128_s18  }
  0x4f   : > { %p139_p2 = scmp.eq.s32.totalorder %s2127_s29, 7  ;;  %p144_p4 = scmp.ne.s32.totalorder %s2939_s13, %s2935_s12 }
  0x50   : > { %p145_p1 = scmp.eq.s32.totalorder %s2128_s6, 7  ;;  %s199_s15 = sand.u32 1, %s2955_s17  }
  0x51   : > { %p3242_p12 = por %p139_p2, %p138_p7  ;;  %s2136_s21 = sshll.u32 %s199_s15, 9 }
  0x52   : > { %p3246_p13 = por %p145_p1, %p144_p4  ;;  %s2327_s10 = sshll.u32 %s2987_s25, 13 }
  0x53   : > { %s3691_s7 = scalar_select %p3242_p12, 1, 0 }
  0x54   : > { %s3692_s0 = scalar_select %p3246_p13, 1, 0 }
  0x55   : > { %s3693_s1 = sld [smem:[#allocation21_spill]]  ;;  %s203_s29 = scalar_lea.vmem [#allocation7], %s2136_s21 }
  0x56   : > { %s211_s6 = sshll.u32 %s203_s29, 4  ;;  %p3694_p10 = scmp.lt.s32.totalorder %s2995_s27, 8  ;;  %s3256_s6 = int_to_ptr.vmem [resolvable:$true] %s211_s6 }
  0x57   : > { %s3266_s30 = scalar_lea.sflag [#allocation8], %s199_s15 }
  0x58   : > { %p3262_p9 = pnand %p3694_p10, %p3223_p3 }
  0x5a   : > { %p2801_p0 = pneg %p3262_p9 }
  0x5b   : > { %s3254_s28 = scalar_lea.hbm %s3693_s1, %s2327_s10  ;;  %s2804_s3 = scalar_lea.hbm %s3693_s1, 16384 }
  0x5c   : > { %s2799_s2 = scalar_lea.hbm %s3254_s28, 8192  ;;  %p2805_p3 = scmp.lt.u32.totalorder %s3254_s28, %s3693_s1 }
  0x5d   : > { %p2800_p11 = scmp.ne.s32.totalorder %s3254_s28, %s2799_s2  ;;  %p2806_p4 = scmp.lt.u32.totalorder %s2804_s3, %s2799_s2 }
  0x5e   : > { %p2808_p10 = scmp.lt.u32.totalorder %s2799_s2, %s3254_s28 }
  0x5f   : > { %p2802_p7 = pnand %p2801_p0, %p2800_p11  ;;  %p2807_p1 = por %p2806_p4, %p2805_p3 }
  0x61   : > { %p2803_p2 = pneg %p2802_p7  ;;  %p2809_p13 = por %p2808_p10, %p2807_p1 }
  0x63   : > { %p2810_p12 = pnand %p2809_p13, %p2803_p2 }
  0x65   : > { %2813 = shalt.err (!%p2810_p12)
}
  0x66   : > { %s2814_s15 = scalar_lea.vmem %s3256_s6, 8192  ;;  %s3001_s22 = smov [#allocation7]  }
  0x67   : > { %p2815_p11 = scmp.ne.s32.totalorder %s3256_s6, %s2814_s15  ;;  %s2819_s21 = sshll.u32 %s3001_s22, 4  ;;  %s2820_s21 = int_to_ptr.vmem [resolvable:$false] %s2819_s21 }
  0x68   : > { %s2821_s10 = scalar_lea.vmem %s2820_s21, 16384  ;;  %p2822_p8 = scmp.lt.s32.totalorder %s3256_s6, %s2820_s21 }
  0x69   : > { %p2817_p7 = pnand %p2815_p11, %p2801_p0  ;;  %p2823_p3 = scmp.lt.s32.totalorder %s2821_s10, %s2814_s15 }
  0x6b   : > { %p2818_p5 = pneg %p2817_p7  ;;  %p2824_p4 = por %p2823_p3, %p2822_p8 }
  0x6d   : > { %p2825_p1 = pnand %p2824_p4, %p2818_p5 }
  0x6f   : > { %2828 = shalt.err (!%p2825_p1)
}
  0x70   : > { %s3696_s2 = smov 16   ;;  %s3697_s3 = smov 256  }
  0x71   : > { %2359 = dma.hbm_to_vmem [thread:$0]  (!%p3262_p9), %s3254_s28, 8192, %s3256_s6, %s3266_s30, %s3697_s3, %s3697_s3, %s3696_s2  }
  0x72   : > { %223 = sbr.rel (%p3198_p6) target bundleno = 833 (0x341), region = 32  ;;  %s225_s29 = sand.u32 (!%p3198_p6), 1, %s2963_s19  }
  0x73   : > { %s2141_s22 = sshll.u32 (!%p3198_p6), %s225_s29, 9  ;;  %s226_s15 = scalar_lea.sflag (!%p3198_p6), [#allocation5], %s225_s29 }
  0x74   : > { %s3300_s21 = scalar_lea.vmem (!%p3198_p6), [#allocation4], %s2141_s22  ;;  %p3698_p8 = scmp.ne.s32.totalorder (!%p3198_p6), %s3686_s8, 0 }
  0x79   : > { %2922 = dma.done.wait (%p3698_p8), %s226_s15, 8192  }
  0x7a   : > { %2924 = vsyncadd (%p3698_p8), %s226_s15, 4294959104  ;;  %s234_s18 = sand.u32 1, %s2951_s16   ;;  %p3699_p6 = scmp.ne.s32.totalorder %s3690_s11, 0 }
  0x7b   : > { %s2142_s10 = sshll.u32 %s234_s18, 9  ;;  %s235_s30 = scalar_lea.sflag [#allocation8], %s234_s18 }
  0x7c   : > { %s3307_s28 = scalar_lea.vmem [#allocation7], %s2142_s10 }
  0x7d   : > { %2926 = dma.done.wait (%p3699_p6), %s235_s30, 8192  }
  0x7e   : > { %2928 = vsyncadd (%p3699_p6), %s235_s30, 4294959104  ;;  %s3700_s23 = sld [smem:[#allocation15_spill]]  ;;  %s269_s6 = sand.u32 1, %s2939_s13  }
  0x7f   : > { %s2143_s8 = sshll.u32 %s269_s6, 7  ;;  %s3701_s15 = sld [smem:[#allocation19_spill]] }
  0x80   : > { %s3322_s10 = scalar_lea.vmem [#allocation9], %s2143_s8  ;;  %s3702_s1 = sld [smem:[#allocation13_spill]] }
  0x84   : > { %s2144_s2 = sshll.u32 %s3700_s23, 3 }
  0x85   : > { %p273_p5 = scmp.lt.s32.totalorder %s2144_s2, 15 }
  0x86   : > { %p2147_p12 = scmp.ne.s32.totalorder %s3702_s1, 0 }
  0x87   : > { %s3743_s2 = smov (!%p273_p5, %s2144_s2), 15  ;;  %v3002_v0 = vmov (!%p2147_p12), 0.0  }
  0x88   : > { %s2328_s3 = sshll.u32 %s3743_s2, 4  ;;  %286 = sbr.rel (%p2147_p12) target bundleno = 152 (0x98), region = 44  ;;  %287 = vst [vmem:[#allocation2] sm:$0xff] (!%p2147_p12), %v3002_v0  ;;  %288 = vst [vmem:[#allocation2 + $0x8] sm:$0xff] (!%p2147_p12), %v3002_v0 }
  0x89   : > { %s3320_s18 = scalar_lea.vmem %s3701_s15, %s2328_s3  ;;  %289 = vst [vmem:[#allocation2 + $0x10] sm:$0xff] (!%p2147_p12), %v3002_v0  ;;  %290 = vst [vmem:[#allocation2 + $0x18] sm:$0xff] (!%p2147_p12), %v3002_v0 }
  0x8a   : > { %291 = vst [vmem:[#allocation2 + $0x20] sm:$0xff] (!%p2147_p12), %v3002_v0  ;;  %292 = vst [vmem:[#allocation2 + $0x28] sm:$0xff] (!%p2147_p12), %v3002_v0 }
  0x8b   : > { %293 = vst [vmem:[#allocation2 + $0x30] sm:$0xff] (!%p2147_p12), %v3002_v0  ;;  %294 = vst [vmem:[#allocation2 + $0x38] sm:$0xff] (!%p2147_p12), %v3002_v0 }
  0x8c   : > { %295 = vst [vmem:[#allocation2 + $0x40] sm:$0xff] (!%p2147_p12), %v3002_v0  ;;  %296 = vst [vmem:[#allocation2 + $0x48] sm:$0xff] (!%p2147_p12), %v3002_v0 }
  0x8d   : > { %297 = vst [vmem:[#allocation2 + $0x50] sm:$0xff] (!%p2147_p12), %v3002_v0  ;;  %298 = vst [vmem:[#allocation2 + $0x58] sm:$0xff] (!%p2147_p12), %v3002_v0 }
  0x8e   : > { %299 = vst [vmem:[#allocation2 + $0x60] sm:$0xff] (!%p2147_p12), %v3002_v0  ;;  %300 = vst [vmem:[#allocation2 + $0x68] sm:$0xff] (!%p2147_p12), %v3002_v0 }
  0x8f   : > { %301 = vst [vmem:[#allocation2 + $0x70] sm:$0xff] %v3002_v0  ;;  %302 = vst [vmem:[#allocation2 + $0x78] sm:$0xff] %v3002_v0 }
  0x90   : > { %303 = vst [vmem:[#allocation2 + $0x80] sm:$0xff] %v3002_v0  ;;  %304 = vst [vmem:[#allocation2 + $0x88] sm:$0xff] %v3002_v0 }
  0x91   : > { %305 = vst [vmem:[#allocation2 + $0x90] sm:$0xff] %v3002_v0  ;;  %306 = vst [vmem:[#allocation2 + $0x98] sm:$0xff] %v3002_v0 }
  0x92   : > { %307 = vst [vmem:[#allocation2 + $0xa0] sm:$0xff] %v3002_v0  ;;  %308 = vst [vmem:[#allocation2 + $0xa8] sm:$0xff] %v3002_v0 }
  0x93   : > { %309 = vst [vmem:[#allocation2 + $0xb0] sm:$0xff] %v3002_v0  ;;  %310 = vst [vmem:[#allocation2 + $0xb8] sm:$0xff] %v3002_v0 }
  0x94   : > { %311 = vst [vmem:[#allocation2 + $0xc0] sm:$0xff] %v3002_v0  ;;  %312 = vst [vmem:[#allocation2 + $0xc8] sm:$0xff] %v3002_v0 }
  0x95   : > { %313 = vst [vmem:[#allocation2 + $0xd0] sm:$0xff] %v3002_v0  ;;  %314 = vst [vmem:[#allocation2 + $0xd8] sm:$0xff] %v3002_v0 }
  0x96   : > { %315 = vst [vmem:[#allocation2 + $0xe0] sm:$0xff] %v3002_v0  ;;  %316 = vst [vmem:[#allocation2 + $0xe8] sm:$0xff] %v3002_v0 }
  0x97   : > { %317 = vst [vmem:[#allocation2 + $0xf0] sm:$0xff] %v3002_v0  ;;  %318 = vst [vmem:[#allocation2 + $0xf8] sm:$0xff] %v3002_v0 }
  0x98 PF: > { %v2501_v1 = vld [vmem:[%s3300_s21 + $0x4] ss:$16 sps:$4 sm:$0xff]   ;;  %v2503_v2 = vld [vmem:[%s3300_s21 + $0xc] ss:$16 sps:$4 sm:$0xff]   ;;  %v2505_v3 = vld [vmem:[%s3300_s21] ss:$16 sps:$4 sm:$0xff]  }
  0x99   : > { %788 = vmatprep.subr.bf16.mxu0 %v2501_v1  ;;  %v2506_v4 = vld [vmem:[%s3300_s21 + $0x8] ss:$16 sps:$4 sm:$0xff]   ;;  %861 = vmatprep.subr.bf16.mxu1 %v2503_v2  ;;  %v2507_v5 = vld [vmem:[%s3300_s21 + $0x24] ss:$16 sps:$4 sm:$0xff]   ;;  %v2509_v6 = vld [vmem:[%s3300_s21 + $0x2c] ss:$16 sps:$4 sm:$0xff]  }
  0x9a   : > { %789 = vmatpush1.bf16.msra.mxu0 %v2505_v3  ;;  %862 = vmatpush1.bf16.msra.mxu1 %v2506_v4  ;;  %v2511_v7 = vld [vmem:[%s3300_s21 + $0x20] ss:$16 sps:$4 sm:$0xff]   ;;  %v2512_v8 = vld [vmem:[%s3300_s21 + $0x28] ss:$16 sps:$4 sm:$0xff]   ;;  %v2513_v9 = vld [vmem:[%s3300_s21 + $0x44] ss:$16 sps:$4 sm:$0xff]  }
  0x9b   : > { %790 = vmatprep.subr.bf16.mxu0 %v2507_v5  ;;  %863 = vmatprep.subr.bf16.mxu1 %v2509_v6  ;;  %v2515_v10 = vld [vmem:[%s3300_s21 + $0x4c] ss:$16 sps:$4 sm:$0xff]   ;;  %v2517_v11 = vld [vmem:[%s3300_s21 + $0x40] ss:$16 sps:$4 sm:$0xff]   ;;  %v2518_v12 = vld [vmem:[%s3300_s21 + $0x48] ss:$16 sps:$4 sm:$0xff]  }
  0x9c   : > { %v2519_v13 = vld [vmem:[%s3300_s21 + $0x64] ss:$16 sps:$4 sm:$0xff]   ;;  %v2521_v14 = vld [vmem:[%s3300_s21 + $0x6c] ss:$16 sps:$4 sm:$0xff]   ;;  %v2523_v15 = vld [vmem:[%s3300_s21 + $0x60] ss:$16 sps:$4 sm:$0xff]  }
  0x9d   : > { %v2524_v16 = vld [vmem:[%s3300_s21 + $0x68] ss:$16 sps:$4 sm:$0xff]   ;;  %v2525_v17 = vld [vmem:[%s3300_s21 + $0x84] ss:$16 sps:$4 sm:$0xff]   ;;  %v2527_v18 = vld [vmem:[%s3300_s21 + $0x8c] ss:$16 sps:$4 sm:$0xff]  }
  0x9e   : > { %791 = vmatpush1.bf16.msra.mxu0 %v2511_v7  ;;  %864 = vmatpush1.bf16.msra.mxu1 %v2512_v8  ;;  %v2529_v19 = vld [vmem:[%s3300_s21 + $0x80] ss:$16 sps:$4 sm:$0xff]   ;;  %v2530_v20 = vld [vmem:[%s3300_s21 + $0x88] ss:$16 sps:$4 sm:$0xff]   ;;  %v2531_v21 = vld [vmem:[%s3300_s21 + $0xa4] ss:$16 sps:$4 sm:$0xff]  }
  0x9f   : > { %792 = vmatprep.subr.bf16.mxu0 %v2513_v9  ;;  %865 = vmatprep.subr.bf16.mxu1 %v2515_v10  ;;  %v2533_v22 = vld [vmem:[%s3300_s21 + $0xac] ss:$16 sps:$4 sm:$0xff]   ;;  %v2535_v23 = vld [vmem:[%s3300_s21 + $0xa0] ss:$16 sps:$4 sm:$0xff]   ;;  %v2536_v24 = vld [vmem:[%s3300_s21 + $0xa8] ss:$16 sps:$4 sm:$0xff]  }
  0xa0   : > { %v2537_v25 = vld [vmem:[%s3300_s21 + $0xc4] ss:$16 sps:$4 sm:$0xff]   ;;  %v2539_v26 = vld [vmem:[%s3300_s21 + $0xcc] ss:$16 sps:$4 sm:$0xff]   ;;  %v2541_v27 = vld [vmem:[%s3300_s21 + $0xc0] ss:$16 sps:$4 sm:$0xff]  }
  0xa1   : > { %v2542_v28 = vld [vmem:[%s3300_s21 + $0xc8] ss:$16 sps:$4 sm:$0xff]   ;;  %s3703_s1 = sld [smem:[#allocation13_spill]]  ;;  %v2543_v29 = vld [vmem:[%s3300_s21 + $0xe4] ss:$16 sps:$4 sm:$0xff]   ;;  %s3704_s8 = sld [smem:[#allocation14_spill]] }
  0xa2   : > { %793 = vmatpush1.bf16.msra.mxu0 %v2517_v11  ;;  %866 = vmatpush1.bf16.msra.mxu1 %v2518_v12  ;;  %v2545_v30 = vld [vmem:[%s3300_s21 + $0xec] ss:$16 sps:$4 sm:$0xff]   ;;  %v2547_v31 = vld [vmem:[%s3300_s21 + $0xe0] ss:$16 sps:$4 sm:$0xff]   ;;  %v2548_v32 = vld [vmem:[%s3300_s21 + $0xe8] ss:$16 sps:$4 sm:$0xff]  }
  0xa3   : > { %794 = vmatprep.subr.bf16.mxu0 %v2519_v13  ;;  %867 = vmatprep.subr.bf16.mxu1 %v2521_v14  ;;  %v2549_v33 = vld [vmem:[%s3300_s21 + $0x104] ss:$16 sps:$4 sm:$0xff]   ;;  %v2551_v34 = vld [vmem:[%s3300_s21 + $0x10c] ss:$16 sps:$4 sm:$0xff]   ;;  %v2553_v35 = vld [vmem:[%s3300_s21 + $0x100] ss:$16 sps:$4 sm:$0xff]  }
  0xa4   : > { %v2554_v36 = vld [vmem:[%s3300_s21 + $0x108] ss:$16 sps:$4 sm:$0xff]   ;;  %v2555_v37 = vld [vmem:[%s3300_s21 + $0x124] ss:$16 sps:$4 sm:$0xff]   ;;  %v2557_v38 = vld [vmem:[%s3300_s21 + $0x12c] ss:$16 sps:$4 sm:$0xff]  }
  0xa5   : > { %v2559_v39 = vld [vmem:[%s3300_s21 + $0x120] ss:$16 sps:$4 sm:$0xff]   ;;  %v2560_v40 = vld [vmem:[%s3300_s21 + $0x128] ss:$16 sps:$4 sm:$0xff]   ;;  %v2561_v41 = vld [vmem:[%s3300_s21 + $0x144] ss:$16 sps:$4 sm:$0xff]  }
  0xa6   : > { %795 = vmatpush1.bf16.msra.mxu0 %v2523_v15  ;;  %868 = vmatpush1.bf16.msra.mxu1 %v2524_v16  ;;  %v2563_v42 = vld [vmem:[%s3300_s21 + $0x14c] ss:$16 sps:$4 sm:$0xff]   ;;  %v2565_v43 = vld [vmem:[%s3300_s21 + $0x140] ss:$16 sps:$4 sm:$0xff]   ;;  %v2566_v44 = vld [vmem:[%s3300_s21 + $0x148] ss:$16 sps:$4 sm:$0xff]  }
  0xa7   : > { %796 = vmatprep.subr.bf16.mxu0 %v2525_v17  ;;  %869 = vmatprep.subr.bf16.mxu1 %v2527_v18  ;;  %s2148_s11 = sshll.u32 %s3703_s1, 8  ;;  %v2567_v45 = vld [vmem:[%s3300_s21 + $0x164] ss:$16 sps:$4 sm:$0xff]   ;;  %v2569_v46 = vld [vmem:[%s3300_s21 + $0x16c] ss:$16 sps:$4 sm:$0xff]   ;;  %p998_p13 = scmp.eq.s32.totalorder %s3703_s1, 1 }
  0xa8   : > { %s320_s30 = sshra.s32 %s2148_s11, 7  ;;  %v2571_v47 = vld [vmem:[%s3300_s21 + $0x160] ss:$16 sps:$4 sm:$0xff]   ;;  %v2572_v48 = vld [vmem:[%s3300_s21 + $0x168] ss:$16 sps:$4 sm:$0xff]   ;;  %p999_p9 = scmp.eq.s32.totalorder %s3704_s8, 0 }
  0xa9   : > { %s2149_s23 = sshll.u32 %s320_s30, 2  ;;  %v2573_v50 = vld [vmem:[%s3300_s21 + $0x184] ss:$16 sps:$4 sm:$0xff]   ;;  %v2575_v51 = vld [vmem:[%s3300_s21 + $0x18c] ss:$16 sps:$4 sm:$0xff]  }
  0xaa   : > { %797 = vmatpush1.bf16.msra.mxu0 %v2529_v19  ;;  %870 = vmatpush1.bf16.msra.mxu1 %v2530_v20  ;;  %s3372_s2 = scalar_lea.vmem %s3320_s18, %s2149_s23  ;;  %v2577_v52 = vld [vmem:[%s3300_s21 + $0x180] ss:$16 sps:$4 sm:$0xff]   ;;  %v2578_v53 = vld [vmem:[%s3300_s21 + $0x188] ss:$16 sps:$4 sm:$0xff]   ;;  %v2579_v54 = vld [vmem:[%s3300_s21 + $0x1a4] ss:$16 sps:$4 sm:$0xff]   ;;  %p3405_p0 = pnand %p999_p9, %p998_p13 }
  0xab   : > { %798 = vmatprep.subr.bf16.mxu0 %v2531_v21  ;;  %871 = vmatprep.subr.bf16.mxu1 %v2533_v22  ;;  %v2599_v49 = vld [vmem:[%s3372_s2 + $0x4] ss:$16 sps:$4 sm:$0xff]   ;;  %v2581_v55 = vld [vmem:[%s3300_s21 + $0x1ac] ss:$16 sps:$4 sm:$0xff]   ;;  %v2583_v56 = vld [vmem:[%s3300_s21 + $0x1a0] ss:$16 sps:$4 sm:$0xff]  }
  0xac   : > { %820 = vmatprep.mubr.bf16.mxu0 %v2599_v49  ;;  %893 = vmatprep.mubr.bf16.mxu1 %v2599_v49  ;;  %v2584_v57 = vld [vmem:[%s3300_s21 + $0x1a8] ss:$16 sps:$4 sm:$0xff]   ;;  %v2585_v58 = vld [vmem:[%s3300_s21 + $0x1c4] ss:$16 sps:$4 sm:$0xff]   ;;  %v2587_v59 = vld [vmem:[%s3300_s21 + $0x1cc] ss:$16 sps:$4 sm:$0xff]  }
  0xad   : > { %v2589_v60 = vld [vmem:[%s3300_s21 + $0x1c0] ss:$16 sps:$4 sm:$0xff]   ;;  %v2590_v61 = vld [vmem:[%s3300_s21 + $0x1c8] ss:$16 sps:$4 sm:$0xff]   ;;  %v2591_v62 = vld [vmem:[%s3300_s21 + $0x1e4] ss:$16 sps:$4 sm:$0xff]  }
  0xae   : > { %799 = vmatpush1.bf16.msra.mxu0 %v2535_v23  ;;  %872 = vmatpush1.bf16.msra.mxu1 %v2536_v24  ;;  %v2593_v63 = vld [vmem:[%s3300_s21 + $0x1ec] ss:$16 sps:$4 sm:$0xff]   ;;  %v2595_v0 = vld [vmem:[%s3300_s21 + $0x1e0] ss:$16 sps:$4 sm:$0xff]   ;;  %v2596_v1 = vld [vmem:[%s3300_s21 + $0x1e8] ss:$16 sps:$4 sm:$0xff]  }
  0xaf   : > { %800 = vmatprep.subr.bf16.mxu0 %v2537_v25  ;;  %873 = vmatprep.subr.bf16.mxu1 %v2539_v26  ;;  %v2597_v2 = vld [vmem:[%s3372_s2] ss:$16 sps:$4 sm:$0xff]   ;;  %v2600_v3 = vld [vmem:[%s3372_s2 + $0x24] ss:$16 sps:$4 sm:$0xff]   ;;  %v333_v11 = vld [vmem:[#allocation2 + $0x8] sm:$0xff] }
  0xb0   : > { %v2602_v4 = vld [vmem:[%s3372_s2 + $0x20] ss:$16 sps:$4 sm:$0xff]   ;;  %v2603_v5 = vld [vmem:[%s3372_s2 + $0x44] ss:$16 sps:$4 sm:$0xff]   ;;  %v335_v12 = vld [vmem:[#allocation2 + $0x18] sm:$0xff] }
  0xb1   : > { %v2605_v6 = vld [vmem:[%s3372_s2 + $0x40] ss:$16 sps:$4 sm:$0xff]   ;;  %v2606_v7 = vld [vmem:[%s3372_s2 + $0x64] ss:$16 sps:$4 sm:$0xff]   ;;  %v337_v21 = vld [vmem:[#allocation2 + $0x28] sm:$0xff] }
  0xb2   : > { %801 = vmatpush1.bf16.msra.mxu0 %v2541_v27  ;;  %874 = vmatpush1.bf16.msra.mxu1 %v2542_v28  ;;  %v2608_v8 = vld [vmem:[%s3372_s2 + $0x60] ss:$16 sps:$4 sm:$0xff]   ;;  %v339_v22 = vld [vmem:[#allocation2 + $0x38] sm:$0xff] }
  0xb3   : > { %802 = vmatprep.subr.bf16.mxu0 %v2543_v29  ;;  %875 = vmatprep.subr.bf16.mxu1 %v2545_v30  ;;  %v332_v9 = vld [vmem:[#allocation2] sm:$0xff]  ;;  %v334_v10 = vld [vmem:[#allocation2 + $0x10] sm:$0xff] }
  0xb4   : > { %v336_v15 = vld [vmem:[#allocation2 + $0x20] sm:$0xff]  ;;  %v338_v16 = vld [vmem:[#allocation2 + $0x30] sm:$0xff] }
  0xb6   : > { %803 = vmatpush1.bf16.msra.mxu0 %v2547_v31  ;;  %876 = vmatpush1.bf16.msra.mxu1 %v2548_v32 }
  0xb7   : > { %804 = vmatprep.subr.bf16.mxu0 %v2549_v33  ;;  %877 = vmatprep.subr.bf16.mxu1 %v2551_v34  ;;  %v340_v33 = vld [vmem:[#allocation2 + $0x40] sm:$0xff]  ;;  %v342_v34 = vld [vmem:[#allocation2 + $0x50] sm:$0xff] }
  0xba   : > { %805 = vmatpush1.bf16.msra.mxu0 %v2553_v35  ;;  %878 = vmatpush1.bf16.msra.mxu1 %v2554_v36  ;;  %v341_v35 = vld [vmem:[#allocation2 + $0x48] sm:$0xff]  ;;  %v343_v36 = vld [vmem:[#allocation2 + $0x58] sm:$0xff] }
  0xbb   : > { %806 = vmatprep.subr.bf16.mxu0 %v2555_v37  ;;  %879 = vmatprep.subr.bf16.mxu1 %v2557_v38 }
  0xbe   : > { %807 = vmatpush1.bf16.msra.mxu0 %v2559_v39  ;;  %880 = vmatpush1.bf16.msra.mxu1 %v2560_v40  ;;  %v344_v39 = vld [vmem:[#allocation2 + $0x60] sm:$0xff]  ;;  %v346_v40 = vld [vmem:[#allocation2 + $0x70] sm:$0xff] }
  0xbf   : > { %808 = vmatprep.subr.bf16.mxu0 %v2561_v41  ;;  %881 = vmatprep.subr.bf16.mxu1 %v2563_v42 }
  0xc2   : > { %809 = vmatpush1.bf16.msra.mxu0 %v2565_v43  ;;  %882 = vmatpush1.bf16.msra.mxu1 %v2566_v44 }
  0xc3   : > { %810 = vmatprep.subr.bf16.mxu0 %v2567_v45  ;;  %883 = vmatprep.subr.bf16.mxu1 %v2569_v46  ;;  %v345_v45 = vld [vmem:[#allocation2 + $0x68] sm:$0xff]  ;;  %v347_v46 = vld [vmem:[#allocation2 + $0x78] sm:$0xff] }
  0xc6   : > { %811 = vmatpush1.bf16.msra.mxu0 %v2571_v47  ;;  %884 = vmatpush1.bf16.msra.mxu1 %v2572_v48 }
  0xc7   : > { %812 = vmatprep.subr.bf16.mxu0 %v2573_v50  ;;  %885 = vmatprep.subr.bf16.mxu1 %v2575_v51 }
  0xca   : > { %813 = vmatpush1.bf16.msra.mxu0 %v2577_v52  ;;  %886 = vmatpush1.bf16.msra.mxu1 %v2578_v53 }
  0xcb   : > { %814 = vmatprep.subr.bf16.mxu0 %v2579_v54  ;;  %887 = vmatprep.subr.bf16.mxu1 %v2581_v55 }
  0xce   : > { %815 = vmatpush1.bf16.msra.mxu0 %v2583_v56  ;;  %888 = vmatpush1.bf16.msra.mxu1 %v2584_v57  ;;  %v348_v57 = vld [vmem:[#allocation2 + $0x80] sm:$0xff] }
  0xcf   : > { %816 = vmatprep.subr.bf16.mxu0 %v2585_v58  ;;  %889 = vmatprep.subr.bf16.mxu1 %v2587_v59  ;;  %v350_v58 = vld [vmem:[#allocation2 + $0x90] sm:$0xff]  ;;  %v349_v59 = vld [vmem:[#allocation2 + $0x88] sm:$0xff] }
  0xd2   : > { %817 = vmatpush1.bf16.msra.mxu0 %v2589_v60  ;;  %890 = vmatpush1.bf16.msra.mxu1 %v2590_v61  ;;  %v351_v60 = vld [vmem:[#allocation2 + $0x98] sm:$0xff] }
  0xd3   : > { %818 = vmatprep.subr.bf16.mxu0 %v2591_v62  ;;  %891 = vmatprep.subr.bf16.mxu1 %v2593_v63  ;;  %v352_v63 = vld [vmem:[#allocation2 + $0xa0] sm:$0xff] }
  0xd6   : > { %819 = vmatpush1.bf16.msra.mxu0 %v2595_v0  ;;  %892 = vmatpush1.bf16.msra.mxu1 %v2596_v1  ;;  %v354_v0 = vld [vmem:[#allocation2 + $0xb0] sm:$0xff] }
  0xd9   : > { %821 = vmatmul.mubr.bf16.vlgmr.msra.gmra.mrb[0].mxu0 %v2597_v2  ;;  %894 = vmatmul.mubr.bf16.vlgmr.msra.gmra.mrb[0].mxu1 %v2597_v2 }
  0xda   : > { %830 = vmatprep.mubr.bf16.mxu0 %v2600_v3  ;;  %903 = vmatprep.mubr.bf16.mxu1 %v2600_v3 }
  0xe1   : > { %831 = vmatmul.mubr.bf16.gmra.mrb[4].mxu0 %v2602_v4  ;;  %904 = vmatmul.mubr.bf16.gmra.mrb[4].mxu1 %v2602_v4 }
  0xe2   : > { %840 = vmatprep.mubr.bf16.mxu0 %v2603_v5  ;;  %913 = vmatprep.mubr.bf16.mxu1 %v2603_v5  ;;  %v353_v5 = vld [vmem:[#allocation2 + $0xa8] sm:$0xff] }
  0xe9   : > { %841 = vmatmul.mubr.bf16.gmra.mrb[8].mxu0 %v2605_v6  ;;  %914 = vmatmul.mubr.bf16.gmra.mrb[8].mxu1 %v2605_v6  ;;  %v355_v6 = vld [vmem:[#allocation2 + $0xb8] sm:$0xff] }
  0xea   : > { %850 = vmatprep.mubr.bf16.mxu0 %v2606_v7  ;;  %923 = vmatprep.mubr.bf16.mxu1 %v2606_v7 }
  0xf1   : > { %851 = vmatmul.mubr.bf16.gmra.mrb[12].mxu0 %v2608_v8  ;;  %924 = vmatmul.mubr.bf16.gmra.mrb[12].mxu1 %v2608_v8 }
 0x1ac   : > { %v822_v13 = vpop.f32.mrb[0].mxu0  ;;  %v895_v14 = vpop.f32.mrb[0].mxu1 }
 0x1ad   : > { %v934_v17 = vadd.f32 %v822_v13, %v332_v9  ;;  %v936_v18 = vadd.f32 %v895_v14, %v334_v10  ;;  %v824_v19 = vpop.f32.mrb[1].mxu0  ;;  %v897_v20 = vpop.f32.mrb[1].mxu1 }
 0x1ae   : > { %v935_v23 = vadd.f32 %v824_v19, %v333_v11  ;;  %v937_v24 = vadd.f32 %v897_v20, %v335_v12  ;;  %v826_v25 = vpop.f32.mrb[2].mxu0  ;;  %v899_v26 = vpop.f32.mrb[2].mxu1  ;;  %v357_v19 = vld [vmem:[#allocation2 + $0xc8] sm:$0xff]  ;;  %v359_v20 = vld [vmem:[#allocation2 + $0xd8] sm:$0xff] }
 0x1af   : > { %966 = vst [vmem:[#allocation2] sm:$0xff] %v934_v17  ;;  %968 = vst [vmem:[#allocation2 + $0x10] sm:$0xff] %v936_v18  ;;  %v938_v27 = vadd.f32 %v826_v25, %v336_v15  ;;  %v940_v28 = vadd.f32 %v899_v26, %v338_v16  ;;  %v828_v29 = vpop.f32.mrb[3].mxu0  ;;  %v901_v30 = vpop.f32.mrb[3].mxu1  ;;  %v356_v17 = vld [vmem:[#allocation2 + $0xc0] sm:$0xff]  ;;  %v358_v18 = vld [vmem:[#allocation2 + $0xd0] sm:$0xff] }
 0x1b0   : > { %967 = vst [vmem:[#allocation2 + $0x8] sm:$0xff] %v935_v23  ;;  %969 = vst [vmem:[#allocation2 + $0x18] sm:$0xff] %v937_v24  ;;  %v939_v31 = vadd.f32 %v828_v29, %v337_v21  ;;  %v941_v32 = vadd.f32 %v901_v30, %v339_v22  ;;  %v360_v23 = vld [vmem:[#allocation2 + $0xe0] sm:$0xff]  ;;  %v362_v24 = vld [vmem:[#allocation2 + $0xf0] sm:$0xff] }
 0x1b1   : > { %970 = vst [vmem:[#allocation2 + $0x20] sm:$0xff] %v938_v27  ;;  %972 = vst [vmem:[#allocation2 + $0x30] sm:$0xff] %v940_v28  ;;  %v361_v29 = vld [vmem:[#allocation2 + $0xe8] sm:$0xff]  ;;  %v363_v30 = vld [vmem:[#allocation2 + $0xf8] sm:$0xff] }
 0x1b2   : > { %971 = vst [vmem:[#allocation2 + $0x28] sm:$0xff] %v939_v31  ;;  %973 = vst [vmem:[#allocation2 + $0x38] sm:$0xff] %v941_v32 }
 0x1b4   : > { %v832_v37 = vpop.f32.mrb[4].mxu0  ;;  %v905_v38 = vpop.f32.mrb[4].mxu1 }
 0x1b5   : > { %v942_v41 = vadd.f32 %v832_v37, %v340_v33  ;;  %v944_v42 = vadd.f32 %v905_v38, %v342_v34  ;;  %v834_v43 = vpop.f32.mrb[5].mxu0  ;;  %v907_v44 = vpop.f32.mrb[5].mxu1 }
 0x1b6   : > { %v943_v47 = vadd.f32 %v834_v43, %v341_v35  ;;  %v945_v48 = vadd.f32 %v907_v44, %v343_v36  ;;  %v836_v49 = vpop.f32.mrb[6].mxu0  ;;  %v909_v50 = vpop.f32.mrb[6].mxu1 }
 0x1b7   : > { %974 = vst [vmem:[#allocation2 + $0x40] sm:$0xff] %v942_v41  ;;  %976 = vst [vmem:[#allocation2 + $0x50] sm:$0xff] %v944_v42  ;;  %v946_v51 = vadd.f32 %v836_v49, %v344_v39  ;;  %v948_v52 = vadd.f32 %v909_v50, %v346_v40  ;;  %v838_v53 = vpop.f32.mrb[7].mxu0  ;;  %v911_v54 = vpop.f32.mrb[7].mxu1  ;;  %v3003_v41 = vmov (!%p3405_p0), 0.0  }
 0x1b8   : > { %975 = vst [vmem:[#allocation2 + $0x48] sm:$0xff] %v943_v47  ;;  %977 = vst [vmem:[#allocation2 + $0x58] sm:$0xff] %v945_v48  ;;  %v947_v55 = vadd.f32 %v838_v53, %v345_v45  ;;  %v949_v56 = vadd.f32 %v911_v54, %v347_v46 }
 0x1b9   : > { %978 = vst [vmem:[#allocation2 + $0x60] sm:$0xff] %v946_v51  ;;  %980 = vst [vmem:[#allocation2 + $0x70] sm:$0xff] %v948_v52 }
 0x1ba   : > { %979 = vst [vmem:[#allocation2 + $0x68] sm:$0xff] %v947_v55  ;;  %981 = vst [vmem:[#allocation2 + $0x78] sm:$0xff] %v949_v56 }
 0x1bb   : > { %1004 = vst [vmem:[#allocation3] sm:$0xff] (!%p3405_p0), %v3003_v41  ;;  %1005 = vst [vmem:[#allocation3 + $0x8] sm:$0xff] (!%p3405_p0), %v3003_v41 }
 0x1bc   : > { %v842_v61 = vpop.f32.mrb[8].mxu0  ;;  %v915_v62 = vpop.f32.mrb[8].mxu1  ;;  %1006 = vst [vmem:[#allocation3 + $0x10] sm:$0xff] (!%p3405_p0), %v3003_v41  ;;  %1007 = vst [vmem:[#allocation3 + $0x18] sm:$0xff] (!%p3405_p0), %v3003_v41 }
 0x1bd   : > { %v950_v1 = vadd.f32 %v842_v61, %v348_v57  ;;  %v952_v2 = vadd.f32 %v915_v62, %v350_v58  ;;  %v844_v3 = vpop.f32.mrb[9].mxu0  ;;  %v917_v4 = vpop.f32.mrb[9].mxu1  ;;  %1008 = vst [vmem:[#allocation3 + $0x20] sm:$0xff] (!%p3405_p0), %v3003_v41  ;;  %1009 = vst [vmem:[#allocation3 + $0x28] sm:$0xff] (!%p3405_p0), %v3003_v41 }
 0x1be   : > { %v951_v7 = vadd.f32 %v844_v3, %v349_v59  ;;  %v953_v8 = vadd.f32 %v917_v4, %v351_v60  ;;  %v846_v9 = vpop.f32.mrb[10].mxu0  ;;  %v919_v10 = vpop.f32.mrb[10].mxu1  ;;  %1010 = vst [vmem:[#allocation3 + $0x30] sm:$0xff] (!%p3405_p0), %v3003_v41  ;;  %1011 = vst [vmem:[#allocation3 + $0x38] sm:$0xff] (!%p3405_p0), %v3003_v41 }
 0x1bf   : > { %982 = vst [vmem:[#allocation2 + $0x80] sm:$0xff] %v950_v1  ;;  %984 = vst [vmem:[#allocation2 + $0x90] sm:$0xff] %v952_v2  ;;  %v954_v11 = vadd.f32 %v846_v9, %v352_v63  ;;  %v956_v12 = vadd.f32 %v919_v10, %v354_v0  ;;  %v848_v13 = vpop.f32.mrb[11].mxu0  ;;  %v921_v14 = vpop.f32.mrb[11].mxu1 }
 0x1c0   : > { %983 = vst [vmem:[#allocation2 + $0x88] sm:$0xff] %v951_v7  ;;  %985 = vst [vmem:[#allocation2 + $0x98] sm:$0xff] %v953_v8  ;;  %v955_v15 = vadd.f32 %v848_v13, %v353_v5  ;;  %v957_v16 = vadd.f32 %v921_v14, %v355_v6 }
 0x1c1   : > { %986 = vst [vmem:[#allocation2 + $0xa0] sm:$0xff] %v954_v11  ;;  %988 = vst [vmem:[#allocation2 + $0xb0] sm:$0xff] %v956_v12 }
 0x1c2   : > { %987 = vst [vmem:[#allocation2 + $0xa8] sm:$0xff] %v955_v15  ;;  %989 = vst [vmem:[#allocation2 + $0xb8] sm:$0xff] %v957_v16 }
 0x1c3   : > { %1012 = vst [vmem:[#allocation3 + $0x40] sm:$0xff] (!%p3405_p0), %v3003_v41  ;;  %1013 = vst [vmem:[#allocation3 + $0x48] sm:$0xff] (!%p3405_p0), %v3003_v41 }
 0x1c4   : > { %v852_v21 = vpop.f32.mrb[12].mxu0  ;;  %v925_v22 = vpop.f32.mrb[12].mxu1  ;;  %1003 = sbr.rel (%p3405_p0) target bundleno = 467 (0x1d3), region = 48  ;;  %1014 = vst [vmem:[#allocation3 + $0x50] sm:$0xff] (!%p3405_p0), %v3003_v41  ;;  %1015 = vst [vmem:[#allocation3 + $0x58] sm:$0xff] (!%p3405_p0), %v3003_v41 }
 0x1c5   : > { %v958_v25 = vadd.f32 %v852_v21, %v356_v17  ;;  %v960_v26 = vadd.f32 %v925_v22, %v358_v18  ;;  %v854_v27 = vpop.f32.mrb[13].mxu0  ;;  %v927_v28 = vpop.f32.mrb[13].mxu1  ;;  %1016 = vst [vmem:[#allocation3 + $0x60] sm:$0xff] (!%p3405_p0), %v3003_v41  ;;  %1017 = vst [vmem:[#allocation3 + $0x68] sm:$0xff] (!%p3405_p0), %v3003_v41 }
 0x1c6   : > { %v959_v31 = vadd.f32 %v854_v27, %v357_v19  ;;  %v961_v32 = vadd.f32 %v927_v28, %v359_v20  ;;  %v856_v33 = vpop.f32.mrb[14].mxu0  ;;  %v929_v34 = vpop.f32.mrb[14].mxu1  ;;  %1018 = vst [vmem:[#allocation3 + $0x70] sm:$0xff] (!%p3405_p0), %v3003_v41  ;;  %1019 = vst [vmem:[#allocation3 + $0x78] sm:$0xff] (!%p3405_p0), %v3003_v41 }
 0x1c7   : > { %990 = vst [vmem:[#allocation2 + $0xc0] sm:$0xff] %v958_v25  ;;  %992 = vst [vmem:[#allocation2 + $0xd0] sm:$0xff] %v960_v26  ;;  %v962_v35 = vadd.f32 %v856_v33, %v360_v23  ;;  %v964_v36 = vadd.f32 %v929_v34, %v362_v24  ;;  %v858_v37 = vpop.f32.mrb[15].mxu0  ;;  %v931_v38 = vpop.f32.mrb[15].mxu1 }
 0x1c8   : > { %991 = vst [vmem:[#allocation2 + $0xc8] sm:$0xff] %v959_v31  ;;  %993 = vst [vmem:[#allocation2 + $0xd8] sm:$0xff] %v961_v32  ;;  %v963_v39 = vadd.f32 %v858_v37, %v361_v29  ;;  %v965_v40 = vadd.f32 %v931_v38, %v363_v30 }
 0x1c9   : > { %994 = vst [vmem:[#allocation2 + $0xe0] sm:$0xff] %v962_v35  ;;  %996 = vst [vmem:[#allocation2 + $0xf0] sm:$0xff] %v964_v36 }
 0x1ca   : > { %995 = vst [vmem:[#allocation2 + $0xe8] sm:$0xff] %v963_v39  ;;  %997 = vst [vmem:[#allocation2 + $0xf8] sm:$0xff] %v965_v40 }
 0x1cb   : > { %1020 = vst [vmem:[#allocation3 + $0x80] sm:$0xff] %v3003_v41  ;;  %1021 = vst [vmem:[#allocation3 + $0x88] sm:$0xff] %v3003_v41 }
 0x1cc   : > { %1022 = vst [vmem:[#allocation3 + $0x90] sm:$0xff] %v3003_v41  ;;  %1023 = vst [vmem:[#allocation3 + $0x98] sm:$0xff] %v3003_v41 }
 0x1cd   : > { %1024 = vst [vmem:[#allocation3 + $0xa0] sm:$0xff] %v3003_v41  ;;  %1025 = vst [vmem:[#allocation3 + $0xa8] sm:$0xff] %v3003_v41 }
 0x1ce   : > { %1026 = vst [vmem:[#allocation3 + $0xb0] sm:$0xff] %v3003_v41  ;;  %1027 = vst [vmem:[#allocation3 + $0xb8] sm:$0xff] %v3003_v41 }
 0x1cf   : > { %1028 = vst [vmem:[#allocation3 + $0xc0] sm:$0xff] %v3003_v41  ;;  %1029 = vst [vmem:[#allocation3 + $0xc8] sm:$0xff] %v3003_v41 }
 0x1d0   : > { %1030 = vst [vmem:[#allocation3 + $0xd0] sm:$0xff] %v3003_v41  ;;  %1031 = vst [vmem:[#allocation3 + $0xd8] sm:$0xff] %v3003_v41 }
 0x1d1   : > { %1032 = vst [vmem:[#allocation3 + $0xe0] sm:$0xff] %v3003_v41  ;;  %1033 = vst [vmem:[#allocation3 + $0xe8] sm:$0xff] %v3003_v41 }
 0x1d2   : > { %1034 = vst [vmem:[#allocation3 + $0xf0] sm:$0xff] %v3003_v41  ;;  %1035 = vst [vmem:[#allocation3 + $0xf8] sm:$0xff] %v3003_v41 }
 0x1d3 PF: > { %s3706_s3 = sld [smem:[#allocation13_spill]] }
 0x1d9   : > { %p2222_p2 = scmp.ne.s32.totalorder %s3706_s3, 1 }
 0x1da   : > { %v2609_v42 = vld [vmem:[%s3307_s28 + $0x4] ss:$16 sps:$4 sm:$0xff] (!%p2222_p2)   ;;  %v2611_v43 = vld [vmem:[%s3307_s28 + $0xc] ss:$16 sps:$4 sm:$0xff] (!%p2222_p2)   ;;  %v2613_v44 = vld [vmem:[%s3307_s28] ss:$16 sps:$4 sm:$0xff] (!%p2222_p2)  }
 0x1db   : > { %1038 = sbr.rel (%p2222_p2) target bundleno = 781 (0x30d), region = 52  ;;  %1623 = vmatprep.subr.bf16.mxu0 (!%p2222_p2), %v2609_v42  ;;  %v2614_v45 = vld [vmem:[%s3307_s28 + $0x8] ss:$16 sps:$4 sm:$0xff] (!%p2222_p2)   ;;  %1696 = vmatprep.subr.bf16.mxu1 (!%p2222_p2), %v2611_v43  ;;  %v2615_v46 = vld [vmem:[%s3307_s28 + $0x24] ss:$16 sps:$4 sm:$0xff] (!%p2222_p2)  }
 0x1dc   : > { %1624 = vmatpush1.bf16.msra.mxu0 (!%p2222_p2), %v2613_v44  ;;  %1697 = vmatpush1.bf16.msra.mxu1 (!%p2222_p2), %v2614_v45  ;;  %v2617_v47 = vld [vmem:[%s3307_s28 + $0x2c] ss:$16 sps:$4 sm:$0xff] (!%p2222_p2)   ;;  %v2619_v48 = vld [vmem:[%s3307_s28 + $0x20] ss:$16 sps:$4 sm:$0xff] (!%p2222_p2)   ;;  %v2620_v49 = vld [vmem:[%s3307_s28 + $0x28] ss:$16 sps:$4 sm:$0xff] (!%p2222_p2)  }
 0x1dd   : > { %1625 = vmatprep.subr.bf16.mxu0 (!%p2222_p2), %v2615_v46  ;;  %1698 = vmatprep.subr.bf16.mxu1 (!%p2222_p2), %v2617_v47  ;;  %v2621_v50 = vld [vmem:[%s3307_s28 + $0x44] ss:$16 sps:$4 sm:$0xff] (!%p2222_p2)   ;;  %v2623_v51 = vld [vmem:[%s3307_s28 + $0x4c] ss:$16 sps:$4 sm:$0xff] (!%p2222_p2)   ;;  %v2625_v52 = vld [vmem:[%s3307_s28 + $0x40] ss:$16 sps:$4 sm:$0xff] (!%p2222_p2)  }
 0x1de   : > { %v2626_v53 = vld [vmem:[%s3307_s28 + $0x48] ss:$16 sps:$4 sm:$0xff] (!%p2222_p2)   ;;  %v2627_v54 = vld [vmem:[%s3307_s28 + $0x64] ss:$16 sps:$4 sm:$0xff] (!%p2222_p2)   ;;  %v2629_v55 = vld [vmem:[%s3307_s28 + $0x6c] ss:$16 sps:$4 sm:$0xff] (!%p2222_p2)  }
 0x1df   : > { %v2631_v56 = vld [vmem:[%s3307_s28 + $0x60] ss:$16 sps:$4 sm:$0xff] (!%p2222_p2)   ;;  %v2632_v57 = vld [vmem:[%s3307_s28 + $0x68] ss:$16 sps:$4 sm:$0xff] (!%p2222_p2)   ;;  %v2633_v58 = vld [vmem:[%s3307_s28 + $0x84] ss:$16 sps:$4 sm:$0xff] (!%p2222_p2)  }
 0x1e0   : > { %1626 = vmatpush1.bf16.msra.mxu0 (!%p2222_p2), %v2619_v48  ;;  %1699 = vmatpush1.bf16.msra.mxu1 (!%p2222_p2), %v2620_v49  ;;  %v2635_v59 = vld [vmem:[%s3307_s28 + $0x8c] ss:$16 sps:$4 sm:$0xff] (!%p2222_p2)   ;;  %v2637_v60 = vld [vmem:[%s3307_s28 + $0x80] ss:$16 sps:$4 sm:$0xff] (!%p2222_p2)   ;;  %v2638_v61 = vld [vmem:[%s3307_s28 + $0x88] ss:$16 sps:$4 sm:$0xff] (!%p2222_p2)  }
 0x1e1   : > { %1627 = vmatprep.subr.bf16.mxu0 (!%p2222_p2), %v2621_v50  ;;  %1700 = vmatprep.subr.bf16.mxu1 (!%p2222_p2), %v2623_v51  ;;  %v2639_v62 = vld [vmem:[%s3307_s28 + $0xa4] ss:$16 sps:$4 sm:$0xff] (!%p2222_p2)   ;;  %v2641_v63 = vld [vmem:[%s3307_s28 + $0xac] ss:$16 sps:$4 sm:$0xff] (!%p2222_p2)   ;;  %v2643_v0 = vld [vmem:[%s3307_s28 + $0xa0] ss:$16 sps:$4 sm:$0xff] (!%p2222_p2)  }
 0x1e2   : > { %v2644_v1 = vld [vmem:[%s3307_s28 + $0xa8] ss:$16 sps:$4 sm:$0xff]   ;;  %v2645_v2 = vld [vmem:[%s3307_s28 + $0xc4] ss:$16 sps:$4 sm:$0xff]   ;;  %v2647_v3 = vld [vmem:[%s3307_s28 + $0xcc] ss:$16 sps:$4 sm:$0xff]  }
 0x1e3   : > { %v2649_v4 = vld [vmem:[%s3307_s28 + $0xc0] ss:$16 sps:$4 sm:$0xff]   ;;  %v2650_v5 = vld [vmem:[%s3307_s28 + $0xc8] ss:$16 sps:$4 sm:$0xff]   ;;  %v2651_v6 = vld [vmem:[%s3307_s28 + $0xe4] ss:$16 sps:$4 sm:$0xff]  }
 0x1e4   : > { %1628 = vmatpush1.bf16.msra.mxu0 %v2625_v52  ;;  %1701 = vmatpush1.bf16.msra.mxu1 %v2626_v53  ;;  %v2653_v7 = vld [vmem:[%s3307_s28 + $0xec] ss:$16 sps:$4 sm:$0xff]   ;;  %v2655_v8 = vld [vmem:[%s3307_s28 + $0xe0] ss:$16 sps:$4 sm:$0xff]   ;;  %v2656_v9 = vld [vmem:[%s3307_s28 + $0xe8] ss:$16 sps:$4 sm:$0xff]  }
 0x1e5   : > { %1629 = vmatprep.subr.bf16.mxu0 %v2627_v54  ;;  %1702 = vmatprep.subr.bf16.mxu1 %v2629_v55  ;;  %v2657_v10 = vld [vmem:[%s3307_s28 + $0x104] ss:$16 sps:$4 sm:$0xff]   ;;  %v2659_v11 = vld [vmem:[%s3307_s28 + $0x10c] ss:$16 sps:$4 sm:$0xff]   ;;  %v2661_v12 = vld [vmem:[%s3307_s28 + $0x100] ss:$16 sps:$4 sm:$0xff]  }
 0x1e6   : > { %v2662_v13 = vld [vmem:[%s3307_s28 + $0x108] ss:$16 sps:$4 sm:$0xff]   ;;  %v2663_v14 = vld [vmem:[%s3307_s28 + $0x124] ss:$16 sps:$4 sm:$0xff]   ;;  %v2665_v15 = vld [vmem:[%s3307_s28 + $0x12c] ss:$16 sps:$4 sm:$0xff]  }
 0x1e7   : > { %v2667_v16 = vld [vmem:[%s3307_s28 + $0x120] ss:$16 sps:$4 sm:$0xff]   ;;  %v2668_v17 = vld [vmem:[%s3307_s28 + $0x128] ss:$16 sps:$4 sm:$0xff]   ;;  %v2669_v18 = vld [vmem:[%s3307_s28 + $0x144] ss:$16 sps:$4 sm:$0xff]  }
 0x1e8   : > { %1630 = vmatpush1.bf16.msra.mxu0 %v2631_v56  ;;  %1703 = vmatpush1.bf16.msra.mxu1 %v2632_v57  ;;  %v2671_v19 = vld [vmem:[%s3307_s28 + $0x14c] ss:$16 sps:$4 sm:$0xff]   ;;  %v2673_v20 = vld [vmem:[%s3307_s28 + $0x140] ss:$16 sps:$4 sm:$0xff]   ;;  %v2674_v21 = vld [vmem:[%s3307_s28 + $0x148] ss:$16 sps:$4 sm:$0xff]  }
 0x1e9   : > { %1631 = vmatprep.subr.bf16.mxu0 %v2633_v58  ;;  %1704 = vmatprep.subr.bf16.mxu1 %v2635_v59  ;;  %v2675_v22 = vld [vmem:[%s3307_s28 + $0x164] ss:$16 sps:$4 sm:$0xff]   ;;  %v2677_v23 = vld [vmem:[%s3307_s28 + $0x16c] ss:$16 sps:$4 sm:$0xff]   ;;  %v2679_v24 = vld [vmem:[%s3307_s28 + $0x160] ss:$16 sps:$4 sm:$0xff]  }
 0x1ea   : > { %v2680_v25 = vld [vmem:[%s3307_s28 + $0x168] ss:$16 sps:$4 sm:$0xff]   ;;  %v2681_v27 = vld [vmem:[%s3307_s28 + $0x184] ss:$16 sps:$4 sm:$0xff]   ;;  %v2683_v30 = vld [vmem:[%s3307_s28 + $0x18c] ss:$16 sps:$4 sm:$0xff]  }
 0x1eb   : > { %v3460_v26 = vld [vmem:[#allocation2 + $0x8] sm:$0xff]  ;;  %v3468_v32 = vld [vmem:[#allocation2] sm:$0xff] }
 0x1ec   : > { %1632 = vmatpush1.bf16.msra.mxu0 %v2637_v60  ;;  %1705 = vmatpush1.bf16.msra.mxu1 %v2638_v61  ;;  %v3463_v28 = vld [vmem:[#allocation2 + $0x28] sm:$0xff]  ;;  %v2224_v29 = vmul.f32 -1.442695, %v3460_v26  ;;  %v3470_v33 = vld [vmem:[#allocation2 + $0x20] sm:$0xff]  ;;  %v2223_v34 = vmul.f32 -1.442695, %v3468_v32 }
 0x1ed   : > { %1633 = vmatprep.subr.bf16.mxu0 %v2639_v62  ;;  %1706 = vmatprep.subr.bf16.mxu1 %v2641_v63  ;;  %v2226_v31 = vmul.f32 -1.442695, %v3463_v28  ;;  %v2225_v35 = vmul.f32 -1.442695, %v3470_v33  ;;  %v3474_v36 = vld [vmem:[#allocation2 + $0x48] sm:$0xff]  ;;  %v3483_v43 = vld [vmem:[#allocation2 + $0x40] sm:$0xff] }
 0x1ee   : > { %2705 = vpow2.f32 %v2224_v29  ;;  %v2685_v37 = vld [vmem:[%s3307_s28 + $0x180] ss:$16 sps:$4 sm:$0xff]   ;;  %v2686_v38 = vld [vmem:[%s3307_s28 + $0x188] ss:$16 sps:$4 sm:$0xff]   ;;  %v2228_v40 = vmul.f32 -1.442695, %v3474_v36 }
 0x1ef   : > { %2707 = vpow2.f32 %v2226_v31  ;;  %v3478_v39 = vld [vmem:[#allocation2 + $0x68] sm:$0xff]  ;;  %v2687_v41 = vld [vmem:[%s3307_s28 + $0x1a4] ss:$16 sps:$4 sm:$0xff]   ;;  %v2227_v45 = vmul.f32 -1.442695, %v3483_v43 }
 0x1f0   : > { %1634 = vmatpush1.bf16.msra.mxu0 %v2643_v0  ;;  %1707 = vmatpush1.bf16.msra.mxu1 %v2644_v1  ;;  %2709 = vpow2.f32 %v2223_v34  ;;  %v2230_v42 = vmul.f32 -1.442695, %v3478_v39  ;;  %v3485_v44 = vld [vmem:[#allocation2 + $0x60] sm:$0xff]  ;;  %v3489_v47 = vld [vmem:[#allocation2 + $0x88] sm:$0xff] }
 0x1f1   : > { %1635 = vmatprep.subr.bf16.mxu0 %v2645_v2  ;;  %1708 = vmatprep.subr.bf16.mxu1 %v2647_v3  ;;  %2711 = vpow2.f32 %v2225_v35  ;;  %v2229_v46 = vmul.f32 -1.442695, %v3485_v44  ;;  %v2689_v48 = vld [vmem:[%s3307_s28 + $0x1ac] ss:$16 sps:$4 sm:$0xff]   ;;  %v2232_v50 = vmul.f32 -1.442695, %v3489_v47 }
 0x1f2   : > { %2713 = vpow2.f32 %v2228_v40  ;;  %v3492_v49 = vld [vmem:[#allocation2 + $0xa8] sm:$0xff]  ;;  %v3496_v52 = vld [vmem:[#allocation2 + $0x80] sm:$0xff]  ;;  %v1056_v40 = vld [vmem:[#allocation2 + $0x18] sm:$0xff] }
 0x1f3   : > { %2715 = vpow2.f32 %v2230_v42  ;;  %v2234_v51 = vmul.f32 -1.442695, %v3492_v49  ;;  %v3498_v53 = vld [vmem:[#allocation2 + $0xa0] sm:$0xff]  ;;  %v2231_v54 = vmul.f32 -1.442695, %v3496_v52  ;;  %v3501_v55 = vld [vmem:[#allocation2 + $0xc8] sm:$0xff] }
 0x1f4   : > { %1636 = vmatpush1.bf16.msra.mxu0 %v2649_v4  ;;  %1709 = vmatpush1.bf16.msra.mxu1 %v2650_v5  ;;  %2717 = vpow2.f32 %v2227_v45  ;;  %v2691_v56 = vld [vmem:[%s3307_s28 + $0x1a0] ss:$16 sps:$4 sm:$0xff]   ;;  %v2692_v57 = vld [vmem:[%s3307_s28 + $0x1a8] ss:$16 sps:$4 sm:$0xff]   ;;  %v2233_v58 = vmul.f32 -1.442695, %v3498_v53 }
 0x1f5   : > { %1637 = vmatprep.subr.bf16.mxu0 %v2651_v6  ;;  %1710 = vmatprep.subr.bf16.mxu1 %v2653_v7  ;;  %2719 = vpow2.f32 %v2229_v46  ;;  %v2693_v59 = vld [vmem:[%s3307_s28 + $0x1c4] ss:$16 sps:$4 sm:$0xff]   ;;  %v2695_v60 = vld [vmem:[%s3307_s28 + $0x1cc] ss:$16 sps:$4 sm:$0xff]   ;;  %v2236_v61 = vmul.f32 -1.442695, %v3501_v55 }
 0x1f6   : > { %2721 = vpow2.f32 %v2232_v50  ;;  %v2697_v0 = vld [vmem:[%s3307_s28 + $0x1c0] ss:$16 sps:$4 sm:$0xff]   ;;  %v2698_v1 = vld [vmem:[%s3307_s28 + $0x1c8] ss:$16 sps:$4 sm:$0xff]   ;;  %v2699_v4 = vld [vmem:[%s3307_s28 + $0x1e4] ss:$16 sps:$4 sm:$0xff]  }
 0x1f7   : > { %2723 = vpow2.f32 %v2234_v51  ;;  %v2701_v5 = vld [vmem:[%s3307_s28 + $0x1ec] ss:$16 sps:$4 sm:$0xff]   ;;  %v3520_v34 = vld [vmem:[#allocation2 + $0xe0] sm:$0xff] }
 0x1f8   : > { %1638 = vmatpush1.bf16.msra.mxu0 %v2655_v8  ;;  %1711 = vmatpush1.bf16.msra.mxu1 %v2656_v9  ;;  %v2706_v62 = vpop.eup %2705  ;;  %2725 = vpow2.f32 %v2231_v54  ;;  %v1058_v45 = vld [vmem:[#allocation2 + $0x38] sm:$0xff]  ;;  %v1055_v54 = vld [vmem:[#allocation2 + $0x10] sm:$0xff] }
 0x1f9   : > { %1639 = vmatprep.subr.bf16.mxu0 %v2657_v10  ;;  %1712 = vmatprep.subr.bf16.mxu1 %v2659_v11  ;;  %v2708_v63 = vpop.eup %2707  ;;  %v1120_v2 = vadd.f32 1.0, %v2706_v62  ;;  %2727 = vpow2.f32 %v2233_v58  ;;  %v1057_v58 = vld [vmem:[#allocation2 + $0x30] sm:$0xff] }
 0x1fa   : > { %v2710_v3 = vpop.eup %2709  ;;  %v1122_v6 = vadd.f32 1.0, %v2708_v63  ;;  %2729 = vpow2.f32 %v2236_v61  ;;  %v1060_v63 = vld [vmem:[#allocation2 + $0x58] sm:$0xff] }
 0x1fb   : > { %v2712_v7 = vpop.eup %2711  ;;  %2731 = vrcp.f32 %v1120_v2  ;;  %v1119_v8 = vadd.f32 1.0, %v2710_v3 }
 0x1fc   : > { %1640 = vmatpush1.bf16.msra.mxu0 %v2661_v12  ;;  %1713 = vmatpush1.bf16.msra.mxu1 %v2662_v13  ;;  %v2714_v9 = vpop.eup %2713  ;;  %2733 = vrcp.f32 %v1122_v6  ;;  %v1121_v10 = vadd.f32 1.0, %v2712_v7  ;;  %v2703_v12 = vld [vmem:[%s3307_s28 + $0x1e0] ss:$16 sps:$4 sm:$0xff]   ;;  %v2704_v13 = vld [vmem:[%s3307_s28 + $0x1e8] ss:$16 sps:$4 sm:$0xff]  }
 0x1fd   : > { %1641 = vmatprep.subr.bf16.mxu0 %v2663_v14  ;;  %1714 = vmatprep.subr.bf16.mxu1 %v2665_v15  ;;  %v2716_v11 = vpop.eup %2715  ;;  %2735 = vrcp.f32 %v1119_v8  ;;  %v1124_v14 = vadd.f32 1.0, %v2714_v9  ;;  %v1059_v7 = vld [vmem:[#allocation2 + $0x50] sm:$0xff] }
 0x1fe   : > { %v2718_v15 = vpop.eup %2717  ;;  %2737 = vrcp.f32 %v1121_v10  ;;  %v1061_v9 = vld [vmem:[#allocation2 + $0x70] sm:$0xff] }
 0x1ff   : > { %2739 = vrcp.f32 %v1124_v14 }
 0x200   : > { %1642 = vmatpush1.bf16.msra.mxu0 %v2667_v16  ;;  %1715 = vmatpush1.bf16.msra.mxu1 %v2668_v17  ;;  %v1126_v16 = vadd.f32 1.0, %v2716_v11  ;;  %v2720_v17 = vpop.eup %2719 }
 0x201   : > { %1643 = vmatprep.subr.bf16.mxu0 %v2669_v18  ;;  %1716 = vmatprep.subr.bf16.mxu1 %v2671_v19  ;;  %v1123_v18 = vadd.f32 1.0, %v2718_v15  ;;  %v2722_v19 = vpop.eup %2721 }
 0x202   : > { %2741 = vrcp.f32 %v1126_v16  ;;  %v1066_v16 = vld [vmem:[#allocation2 + $0xb8] sm:$0xff] }
 0x203   : > { %2743 = vrcp.f32 %v1123_v18 }
 0x204   : > { %1644 = vmatpush1.bf16.msra.mxu0 %v2673_v20  ;;  %1717 = vmatpush1.bf16.msra.mxu1 %v2674_v21  ;;  %v1125_v20 = vadd.f32 1.0, %v2720_v17  ;;  %v3515_v21 = vld [vmem:[#allocation2 + $0xe8] sm:$0xff] }
 0x205   : > { %1645 = vmatprep.subr.bf16.mxu0 %v2675_v22  ;;  %1718 = vmatprep.subr.bf16.mxu1 %v2677_v23  ;;  %v2724_v22 = vpop.eup %2723  ;;  %v1128_v23 = vadd.f32 1.0, %v2722_v19  ;;  %v2238_v31 = vmul.f32 -1.442695, %v3515_v21 }
 0x206   : > { %2745 = vrcp.f32 %v1125_v20 }
 0x207   : > { %2747 = vrcp.f32 %v1128_v23 }
 0x208   : > { %1646 = vmatpush1.bf16.msra.mxu0 %v2679_v24  ;;  %1719 = vmatpush1.bf16.msra.mxu1 %v2680_v25  ;;  %v2726_v24 = vpop.eup %2725  ;;  %v1130_v25 = vadd.f32 1.0, %v2724_v22 }
 0x209   : > { %1647 = vmatprep.subr.bf16.mxu0 %v2681_v27  ;;  %1720 = vmatprep.subr.bf16.mxu1 %v2683_v30  ;;  %v3517_v27 = vld [vmem:[#allocation2 + $0xc0] sm:$0xff]  ;;  %v2728_v29 = vpop.eup %2727  ;;  %v1127_v30 = vadd.f32 1.0, %v2726_v24 }
 0x20a   : > { %v2730_v35 = vpop.eup %2729  ;;  %2749 = vrcp.f32 %v1130_v25 }
 0x20b   : > { %2751 = vrcp.f32 %v1127_v30  ;;  %v1132_v3 = vadd.f32 1.0, %v2730_v35 }
 0x20c   : > { %1648 = vmatpush1.bf16.msra.mxu0 %v2685_v37  ;;  %1721 = vmatpush1.bf16.msra.mxu1 %v2686_v38  ;;  %v1129_v37 = vadd.f32 1.0, %v2728_v29  ;;  %v2732_v38 = vpop.eup %2731 }
 0x20d   : > { %1649 = vmatprep.subr.bf16.mxu0 %v2687_v41  ;;  %1722 = vmatprep.subr.bf16.mxu1 %v2689_v48  ;;  %v2235_v41 = vmul.f32 -1.442695, %v3517_v27  ;;  %v2734_v42 = vpop.eup %2733  ;;  %v1168_v46 = vmul.f32 %v2732_v38, %v3460_v26  ;;  %v2237_v48 = vmul.f32 -1.442695, %v3520_v34  ;;  %v1065_v38 = vld [vmem:[#allocation2 + $0xb0] sm:$0xff] }
 0x20e   : > { %2753 = vrcp.f32 %v1129_v37  ;;  %v2736_v50 = vpop.eup %2735  ;;  %v1170_v51 = vmul.f32 %v2734_v42, %v3463_v28  ;;  %v1063_v37 = vld [vmem:[#allocation2 + $0x90] sm:$0xff] }
 0x20f   : > { %2755 = vpow2.f32 %v2238_v31 }
 0x210   : > { %1650 = vmatpush1.bf16.msra.mxu0 %v2691_v56  ;;  %1723 = vmatpush1.bf16.msra.mxu1 %v2692_v57  ;;  %v2738_v56 = vpop.eup %2737  ;;  %v1184_v57 = vmul.f32 %v1168_v46, %v1056_v40  ;;  %v1186_v61 = vmul.f32 %v1170_v51, %v1058_v45  ;;  %2757 = vpow2.f32 %v2235_v41 }
 0x211   : > { %1651 = vmatprep.subr.bf16.mxu0 %v2693_v59  ;;  %1724 = vmatprep.subr.bf16.mxu1 %v2695_v60  ;;  %v1167_v59 = vmul.f32 %v2736_v50, %v3468_v32  ;;  %v2740_v60 = vpop.eup %2739  ;;  %v1169_v62 = vmul.f32 %v2738_v56, %v3470_v33  ;;  %2759 = vpow2.f32 %v2237_v48  ;;  %v1070_v50 = vld [vmem:[#allocation2 + $0xf8] sm:$0xff] }
 0x212   : > { %v2742_v26 = vpop.eup %2741  ;;  %v1172_v2 = vmul.f32 %v2740_v60, %v3474_v36  ;;  %2761 = vrcp.f32 %v1132_v3  ;;  %v1069_v60 = vld [vmem:[#allocation2 + $0xf0] sm:$0xff]  ;;  %v1202_v3 = vld [vmem:[#allocation3 + $0x18] sm:$0xff] }
 0x213   : > { %v2744_v28 = vpop.eup %2743  ;;  %v1174_v6 = vmul.f32 %v2742_v26, %v3478_v39 }
 0x214   : > { %1652 = vmatpush1.bf16.msra.mxu0 %v2697_v0  ;;  %1725 = vmatpush1.bf16.msra.mxu1 %v2698_v1  ;;  %v1183_v0 = vmul.f32 %v1167_v59, %v1055_v54  ;;  %v1062_v1 = vld [vmem:[#allocation2 + $0x78] sm:$0xff]  ;;  %v2746_v32 = vpop.eup %2745  ;;  %v1188_v8 = vmul.f32 %v1172_v2, %v1060_v63  ;;  %v1171_v33 = vmul.f32 %v2744_v28, %v3483_v43  ;;  %v1200_v2 = vld [vmem:[#allocation3 + $0x8] sm:$0xff] }
 0x215   : > { %1653 = vmatprep.subr.bf16.mxu0 %v2699_v4  ;;  %1726 = vmatprep.subr.bf16.mxu1 %v2701_v5  ;;  %v1232_v4 = vpack.c.bf16 %v1186_v61, %v1184_v57  ;;  %v1185_v5 = vmul.f32 %v1169_v62, %v1057_v58  ;;  %v2748_v10 = vpop.eup %2747  ;;  %v1173_v36 = vmul.f32 %v2746_v32, %v3485_v44  ;;  %v1067_v57 = vld [vmem:[#allocation2 + $0xd0] sm:$0xff] }
 0x216   : > { %v2750_v14 = vpop.eup %2749  ;;  %v1187_v15 = vmul.f32 %v1171_v33, %v1059_v7  ;;  %v1176_v17 = vmul.f32 %v2748_v10, %v3489_v47 }
 0x217   : > { %1655 = vmatprep.mubr.bf16.mxu0 %v1232_v4  ;;  %1728 = vmatprep.mubr.bf16.mxu1 %v1232_v4  ;;  %v1231_v11 = vpack.c.bf16 %v1185_v5, %v1183_v0  ;;  %v2752_v39 = vpop.eup %2751  ;;  %v1189_v19 = vmul.f32 %v1173_v36, %v1061_v9  ;;  %v1178_v43 = vmul.f32 %v2750_v14, %v3492_v49  ;;  %v1203_v5 = vld [vmem:[#allocation3 + $0x20] sm:$0xff]  ;;  %v1206_v9 = vld [vmem:[#allocation3 + $0x38] sm:$0xff] }
 0x218   : > { %1654 = vmatpush1.bf16.msra.mxu0 %v2703_v12  ;;  %1727 = vmatpush1.bf16.msra.mxu1 %v2704_v13  ;;  %v1190_v12 = vmul.f32 %v1174_v6, %v1062_v1  ;;  %v1064_v13 = vld [vmem:[#allocation2 + $0x98] sm:$0xff]  ;;  %v2754_v20 = vpop.eup %2753  ;;  %v1175_v30 = vmul.f32 %v2752_v39, %v3496_v52  ;;  %v1199_v1 = vld [vmem:[#allocation3] sm:$0xff]  ;;  %v1205_v6 = vld [vmem:[#allocation3 + $0x30] sm:$0xff] }
 0x219   : > { %v1192_v22 = vmul.f32 %v1176_v17, %v1064_v13  ;;  %v2756_v23 = vpop.eup %2755  ;;  %v1194_v44 = vmul.f32 %v1178_v43, %v1066_v16  ;;  %v1233_v29 = vpack.c.bf16 %v1189_v19, %v1187_v15  ;;  %v1177_v47 = vmul.f32 %v2754_v20, %v3498_v53  ;;  %v1068_v53 = vld [vmem:[#allocation2 + $0xd8] sm:$0xff]  ;;  %v1207_v39 = vld [vmem:[#allocation3 + $0x40] sm:$0xff]  ;;  %v1208_v19 = vld [vmem:[#allocation3 + $0x48] sm:$0xff] }
 0x21a   : > { %v1234_v18 = vpack.c.bf16 %v1190_v12, %v1188_v8  ;;  %v1134_v24 = vadd.f32 1.0, %v2756_v23  ;;  %v2758_v25 = vpop.eup %2757  ;;  %v1191_v41 = vmul.f32 %v1175_v30, %v1063_v37  ;;  %v1204_v8 = vld [vmem:[#allocation3 + $0x28] sm:$0xff]  ;;  %v1210_v43 = vld [vmem:[#allocation3 + $0x58] sm:$0xff]  ;;  %v1211_v23 = vld [vmem:[#allocation3 + $0x60] sm:$0xff] }
 0x21b   : > { %1656 = vmatmul.mubr.bf16.vlgmr.msra.gmra.mrb[0].mxu0 %v1231_v11  ;;  %1729 = vmatmul.mubr.bf16.vlgmr.msra.gmra.mrb[0].mxu1 %v1231_v11  ;;  %v2760_v31 = vpop.eup %2759  ;;  %v1236_v35 = vpack.c.bf16 %v1194_v44, %v1192_v22  ;;  %v1131_v40 = vadd.f32 1.0, %v2758_v25  ;;  %v1193_v42 = vmul.f32 %v1177_v47, %v1065_v38  ;;  %v1213_v44 = vld [vmem:[#allocation3 + $0x70] sm:$0xff]  ;;  %v1212_v47 = vld [vmem:[#allocation3 + $0x68] sm:$0xff] }
 0x21c   : > { %1665 = vmatprep.mubr.bf16.mxu0 %v1234_v18  ;;  %1738 = vmatprep.mubr.bf16.mxu1 %v1234_v18  ;;  %2763 = vrcp.f32 %v1134_v24  ;;  %v1133_v49 = vadd.f32 1.0, %v2760_v31  ;;  %v2762_v45 = vpop.eup %2761  ;;  %v1209_v18 = vld [vmem:[#allocation3 + $0x50] sm:$0xff]  ;;  %v1214_v31 = vld [vmem:[#allocation3 + $0x78] sm:$0xff] }
 0x21d   : > { %2765 = vrcp.f32 %v1131_v40  ;;  %v1235_v46 = vpack.c.bf16 %v1193_v42, %v1191_v41  ;;  %v1180_v52 = vmul.f32 %v2762_v45, %v3501_v55 }
 0x21e   : > { %2767 = vrcp.f32 %v1133_v49 }
 0x21f   : > { %v1196_v54 = vmul.f32 %v1180_v52, %v1068_v53  ;;  %v1215_v53 = vld [vmem:[#allocation3 + $0x80] sm:$0xff] }
 0x223   : > { %1666 = vmatmul.mubr.bf16.gmra.mrb[4].mxu0 %v1233_v29  ;;  %1739 = vmatmul.mubr.bf16.gmra.mrb[4].mxu1 %v1233_v29 }
 0x224   : > { %1675 = vmatprep.mubr.bf16.mxu0 %v1236_v35  ;;  %1748 = vmatprep.mubr.bf16.mxu1 %v1236_v35 }
 0x226   : > { %v2764_v48 = vpop.eup %2763 }
 0x227   : > { %v1182_v51 = vmul.f32 %v2764_v48, %v3515_v21  ;;  %v2766_v56 = vpop.eup %2765  ;;  %v1201_v21 = vld [vmem:[#allocation3 + $0x10] sm:$0xff] }
 0x228   : > { %v2768_v58 = vpop.eup %2767  ;;  %v1179_v61 = vmul.f32 %v2766_v56, %v3517_v27  ;;  %v1217_v48 = vld [vmem:[#allocation3 + $0x90] sm:$0xff] }
 0x229   : > { %v1198_v59 = vmul.f32 %v1182_v51, %v1070_v50  ;;  %v1181_v62 = vmul.f32 %v2768_v58, %v3520_v34  ;;  %v1216_v50 = vld [vmem:[#allocation3 + $0x88] sm:$0xff]  ;;  %v1218_v51 = vld [vmem:[#allocation3 + $0x98] sm:$0xff]  ;;  %v1221_v58 = vld [vmem:[#allocation3 + $0xb0] sm:$0xff] }
 0x22a   : > { %v1195_v26 = vmul.f32 %v1179_v61, %v1067_v57  ;;  %v1219_v57 = vld [vmem:[#allocation3 + $0xa0] sm:$0xff] }
 0x22b   : > { %1676 = vmatmul.mubr.bf16.gmra.mrb[8].mxu0 %v1235_v46  ;;  %1749 = vmatmul.mubr.bf16.gmra.mrb[8].mxu1 %v1235_v46  ;;  %v1238_v63 = vpack.c.bf16 %v1198_v59, %v1196_v54  ;;  %v1197_v55 = vmul.f32 %v1181_v62, %v1069_v60 }
 0x22d   : > { %1685 = vmatprep.mubr.bf16.mxu0 %v1238_v63  ;;  %1758 = vmatprep.mubr.bf16.mxu1 %v1238_v63  ;;  %v1237_v0 = vpack.c.bf16 %v1197_v55, %v1195_v26  ;;  %v1220_v63 = vld [vmem:[#allocation3 + $0xa8] sm:$0xff]  ;;  %v1222_v26 = vld [vmem:[#allocation3 + $0xb8] sm:$0xff] }
 0x233   : > { %1686 = vmatmul.mubr.bf16.gmra.mrb[12].mxu0 %v1237_v0  ;;  %1759 = vmatmul.mubr.bf16.gmra.mrb[12].mxu1 %v1237_v0 }
 0x2ee   : > { %v1657_v28 = vpop.f32.mrb[0].mxu0  ;;  %v1730_v4 = vpop.f32.mrb[0].mxu1 }
 0x2ef   : > { %v1769_v7 = vadd.f32 %v1657_v28, %v1199_v1  ;;  %v1771_v27 = vadd.f32 %v1730_v4, %v1201_v21  ;;  %v1659_v32 = vpop.f32.mrb[1].mxu0  ;;  %v1732_v34 = vpop.f32.mrb[1].mxu1 }
 0x2f0   : > { %v1770_v33 = vadd.f32 %v1659_v32, %v1200_v2  ;;  %v1772_v10 = vadd.f32 %v1732_v34, %v1202_v3  ;;  %v1661_v11 = vpop.f32.mrb[2].mxu0  ;;  %v1734_v12 = vpop.f32.mrb[2].mxu1  ;;  %v1224_v32 = vld [vmem:[#allocation3 + $0xc8] sm:$0xff]  ;;  %v1226_v34 = vld [vmem:[#allocation3 + $0xd8] sm:$0xff] }
 0x2f1   : > { %1801 = vst [vmem:[#allocation3] sm:$0xff] %v1769_v7  ;;  %1803 = vst [vmem:[#allocation3 + $0x10] sm:$0xff] %v1771_v27  ;;  %v1773_v36 = vadd.f32 %v1661_v11, %v1203_v5  ;;  %v1775_v13 = vadd.f32 %v1734_v12, %v1205_v6  ;;  %v1663_v14 = vpop.f32.mrb[3].mxu0  ;;  %v1736_v15 = vpop.f32.mrb[3].mxu1  ;;  %v1223_v7 = vld [vmem:[#allocation3 + $0xc0] sm:$0xff]  ;;  %v1225_v27 = vld [vmem:[#allocation3 + $0xd0] sm:$0xff] }
 0x2f2   : > { %1802 = vst [vmem:[#allocation3 + $0x8] sm:$0xff] %v1770_v33  ;;  %1804 = vst [vmem:[#allocation3 + $0x18] sm:$0xff] %v1772_v10  ;;  %v1774_v16 = vadd.f32 %v1663_v14, %v1204_v8  ;;  %v1776_v17 = vadd.f32 %v1736_v15, %v1206_v9  ;;  %v1227_v33 = vld [vmem:[#allocation3 + $0xe0] sm:$0xff]  ;;  %v1229_v10 = vld [vmem:[#allocation3 + $0xf0] sm:$0xff] }
 0x2f3   : > { %1805 = vst [vmem:[#allocation3 + $0x20] sm:$0xff] %v1773_v36  ;;  %1807 = vst [vmem:[#allocation3 + $0x30] sm:$0xff] %v1775_v13  ;;  %v1228_v14 = vld [vmem:[#allocation3 + $0xe8] sm:$0xff]  ;;  %v1230_v15 = vld [vmem:[#allocation3 + $0xf8] sm:$0xff] }
 0x2f4   : > { %1806 = vst [vmem:[#allocation3 + $0x28] sm:$0xff] %v1774_v16  ;;  %1808 = vst [vmem:[#allocation3 + $0x38] sm:$0xff] %v1776_v17 }
 0x2f6   : > { %v1667_v20 = vpop.f32.mrb[4].mxu0  ;;  %v1740_v22 = vpop.f32.mrb[4].mxu1 }
 0x2f7   : > { %v1777_v24 = vadd.f32 %v1667_v20, %v1207_v39  ;;  %v1779_v25 = vadd.f32 %v1740_v22, %v1209_v18  ;;  %v1669_v29 = vpop.f32.mrb[5].mxu0  ;;  %v1742_v30 = vpop.f32.mrb[5].mxu1 }
 0x2f8   : > { %v1778_v35 = vadd.f32 %v1669_v29, %v1208_v19  ;;  %v1780_v37 = vadd.f32 %v1742_v30, %v1210_v43  ;;  %v1671_v38 = vpop.f32.mrb[6].mxu0  ;;  %v1744_v40 = vpop.f32.mrb[6].mxu1 }
 0x2f9   : > { %1809 = vst [vmem:[#allocation3 + $0x40] sm:$0xff] %v1777_v24  ;;  %1811 = vst [vmem:[#allocation3 + $0x50] sm:$0xff] %v1779_v25  ;;  %v1781_v49 = vadd.f32 %v1671_v38, %v1211_v23  ;;  %v1783_v41 = vadd.f32 %v1744_v40, %v1213_v44  ;;  %v1673_v42 = vpop.f32.mrb[7].mxu0  ;;  %v1746_v45 = vpop.f32.mrb[7].mxu1 }
 0x2fa   : > { %1810 = vst [vmem:[#allocation3 + $0x48] sm:$0xff] %v1778_v35  ;;  %1812 = vst [vmem:[#allocation3 + $0x58] sm:$0xff] %v1780_v37  ;;  %v1782_v46 = vadd.f32 %v1673_v42, %v1212_v47  ;;  %v1784_v52 = vadd.f32 %v1746_v45, %v1214_v31 }
 0x2fb   : > { %1813 = vst [vmem:[#allocation3 + $0x60] sm:$0xff] %v1781_v49  ;;  %1815 = vst [vmem:[#allocation3 + $0x70] sm:$0xff] %v1783_v41 }
 0x2fc   : > { %1814 = vst [vmem:[#allocation3 + $0x68] sm:$0xff] %v1782_v46  ;;  %1816 = vst [vmem:[#allocation3 + $0x78] sm:$0xff] %v1784_v52 }
 0x2fe   : > { %v1677_v54 = vpop.f32.mrb[8].mxu0  ;;  %v1750_v56 = vpop.f32.mrb[8].mxu1 }
 0x2ff   : > { %v1785_v59 = vadd.f32 %v1677_v54, %v1215_v53  ;;  %v1787_v60 = vadd.f32 %v1750_v56, %v1217_v48  ;;  %v1679_v61 = vpop.f32.mrb[9].mxu0  ;;  %v1752_v62 = vpop.f32.mrb[9].mxu1 }
 0x300   : > { %v1786_v55 = vadd.f32 %v1679_v61, %v1216_v50  ;;  %v1788_v0 = vadd.f32 %v1752_v62, %v1218_v51  ;;  %v1681_v1 = vpop.f32.mrb[10].mxu0  ;;  %v1754_v21 = vpop.f32.mrb[10].mxu1 }
 0x301   : > { %1817 = vst [vmem:[#allocation3 + $0x80] sm:$0xff] %v1785_v59  ;;  %1819 = vst [vmem:[#allocation3 + $0x90] sm:$0xff] %v1787_v60  ;;  %v1789_v2 = vadd.f32 %v1681_v1, %v1219_v57  ;;  %v1791_v3 = vadd.f32 %v1754_v21, %v1221_v58  ;;  %v1683_v28 = vpop.f32.mrb[11].mxu0  ;;  %v1756_v4 = vpop.f32.mrb[11].mxu1 }
 0x302   : > { %1818 = vst [vmem:[#allocation3 + $0x88] sm:$0xff] %v1786_v55  ;;  %1820 = vst [vmem:[#allocation3 + $0x98] sm:$0xff] %v1788_v0  ;;  %v1790_v5 = vadd.f32 %v1683_v28, %v1220_v63  ;;  %v1792_v6 = vadd.f32 %v1756_v4, %v1222_v26 }
 0x303   : > { %1821 = vst [vmem:[#allocation3 + $0xa0] sm:$0xff] %v1789_v2  ;;  %1823 = vst [vmem:[#allocation3 + $0xb0] sm:$0xff] %v1791_v3 }
 0x304   : > { %1822 = vst [vmem:[#allocation3 + $0xa8] sm:$0xff] %v1790_v5  ;;  %1824 = vst [vmem:[#allocation3 + $0xb8] sm:$0xff] %v1792_v6 }
 0x306   : > { %v1687_v8 = vpop.f32.mrb[12].mxu0  ;;  %v1760_v9 = vpop.f32.mrb[12].mxu1 }
 0x307   : > { %v1793_v11 = vadd.f32 %v1687_v8, %v1223_v7  ;;  %v1795_v12 = vadd.f32 %v1760_v9, %v1225_v27  ;;  %v1689_v36 = vpop.f32.mrb[13].mxu0  ;;  %v1762_v13 = vpop.f32.mrb[13].mxu1 }
 0x308   : > { %v1794_v16 = vadd.f32 %v1689_v36, %v1224_v32  ;;  %v1796_v17 = vadd.f32 %v1762_v13, %v1226_v34  ;;  %v1691_v39 = vpop.f32.mrb[14].mxu0  ;;  %v1764_v18 = vpop.f32.mrb[14].mxu1 }
 0x309   : > { %1825 = vst [vmem:[#allocation3 + $0xc0] sm:$0xff] %v1793_v11  ;;  %1827 = vst [vmem:[#allocation3 + $0xd0] sm:$0xff] %v1795_v12  ;;  %v1797_v19 = vadd.f32 %v1691_v39, %v1227_v33  ;;  %v1799_v43 = vadd.f32 %v1764_v18, %v1229_v10  ;;  %v1693_v20 = vpop.f32.mrb[15].mxu0  ;;  %v1766_v22 = vpop.f32.mrb[15].mxu1 }
 0x30a   : > { %1826 = vst [vmem:[#allocation3 + $0xc8] sm:$0xff] %v1794_v16  ;;  %1828 = vst [vmem:[#allocation3 + $0xd8] sm:$0xff] %v1796_v17  ;;  %v1798_v23 = vadd.f32 %v1693_v20, %v1228_v14  ;;  %v1800_v44 = vadd.f32 %v1766_v22, %v1230_v15 }
 0x30b   : > { %1829 = vst [vmem:[#allocation3 + $0xe0] sm:$0xff] %v1797_v19  ;;  %1831 = vst [vmem:[#allocation3 + $0xf0] sm:$0xff] %v1799_v43 }
 0x30c   : > { %1830 = vst [vmem:[#allocation3 + $0xe8] sm:$0xff] %v1798_v23  ;;  %1832 = vst [vmem:[#allocation3 + $0xf8] sm:$0xff] %v1800_v44 }
 0x30d PF: > { %s3707_s28 = sld [smem:[#allocation14_spill]] }
 0x313   : > { %p1833_p10 = scmp.eq.s32.totalorder %s3707_s28, 1 }
 0x315   : > { %p1834_p11 = pnand %p1833_p10, %p998_p13 }
 0x316   : > { %v1838_v24 = vld [vmem:[#allocation3] sm:$0xff] (!%p1834_p11)  ;;  %v1839_v25 = vld [vmem:[#allocation3 + $0x8] sm:$0xff] (!%p1834_p11)  ;;  %v1840_v29 = vld [vmem:[#allocation3 + $0x10] sm:$0xff] (!%p1834_p11) }
 0x317   : > { %1837 = sbr.rel (%p1834_p11) target bundleno = 805 (0x325), region = 56  ;;  %v2329_v30 = vpack.c.bf16 (!%p1834_p11), %v1839_v25, %v1838_v24  ;;  %v1841_v47 = vld [vmem:[#allocation3 + $0x18] sm:$0xff] (!%p1834_p11)  ;;  %v1842_v31 = vld [vmem:[#allocation3 + $0x20] sm:$0xff] (!%p1834_p11)  ;;  %v1843_v35 = vld [vmem:[#allocation3 + $0x28] sm:$0xff] (!%p1834_p11) }
 0x318   : > { %v2330_v37 = vpack.c.bf16 (!%p1834_p11), %v1841_v47, %v1840_v29  ;;  %v2331_v38 = vpack.c.bf16 (!%p1834_p11), %v1843_v35, %v1842_v31  ;;  %v1844_v40 = vld [vmem:[#allocation3 + $0x30] sm:$0xff] (!%p1834_p11)  ;;  %v1845_v49 = vld [vmem:[#allocation3 + $0x38] sm:$0xff] (!%p1834_p11)  ;;  %v1846_v41 = vld [vmem:[#allocation3 + $0x40] sm:$0xff] (!%p1834_p11) }
 0x319   : > { %1966 = vst [vmem:[%s3322_s10] sm:$0xff] (!%p1834_p11), %v2329_v30  ;;  %v2332_v42 = vpack.c.bf16 (!%p1834_p11), %v1845_v49, %v1844_v40  ;;  %v1847_v45 = vld [vmem:[#allocation3 + $0x48] sm:$0xff] (!%p1834_p11)  ;;  %v1848_v46 = vld [vmem:[#allocation3 + $0x50] sm:$0xff] (!%p1834_p11)  ;;  %v1849_v52 = vld [vmem:[#allocation3 + $0x58] sm:$0xff] (!%p1834_p11) }
 0x31a   : > { %1967 = vst [vmem:[%s3322_s10 + $0x8] sm:$0xff] (!%p1834_p11), %v2330_v37  ;;  %1968 = vst [vmem:[%s3322_s10 + $0x10] sm:$0xff] (!%p1834_p11), %v2331_v38  ;;  %v2333_v53 = vpack.c.bf16 (!%p1834_p11), %v1847_v45, %v1846_v41  ;;  %v2334_v48 = vpack.c.bf16 (!%p1834_p11), %v1849_v52, %v1848_v46  ;;  %v1850_v50 = vld [vmem:[#allocation3 + $0x60] sm:$0xff] (!%p1834_p11)  ;;  %v1851_v51 = vld [vmem:[#allocation3 + $0x68] sm:$0xff] (!%p1834_p11) }
 0x31b   : > { %v1852_v54 = vld [vmem:[#allocation3 + $0x70] sm:$0xff] (!%p1834_p11)  ;;  %1969 = vst [vmem:[%s3322_s10 + $0x18] sm:$0xff] (!%p1834_p11), %v2332_v42  ;;  %v2335_v56 = vpack.c.bf16 (!%p1834_p11), %v1851_v51, %v1850_v50  ;;  %v1853_v57 = vld [vmem:[#allocation3 + $0x78] sm:$0xff] (!%p1834_p11)  ;;  %v1854_v58 = vld [vmem:[#allocation3 + $0x80] sm:$0xff] (!%p1834_p11) }
 0x31c   : > { %v1855_v59 = vld [vmem:[#allocation3 + $0x88] sm:$0xff] (!%p1834_p11)  ;;  %1970 = vst [vmem:[%s3322_s10 + $0x20] sm:$0xff] (!%p1834_p11), %v2333_v53  ;;  %1971 = vst [vmem:[%s3322_s10 + $0x28] sm:$0xff] (!%p1834_p11), %v2334_v48  ;;  %v2336_v60 = vpack.c.bf16 (!%p1834_p11), %v1853_v57, %v1852_v54  ;;  %v1856_v62 = vld [vmem:[#allocation3 + $0x90] sm:$0xff] (!%p1834_p11) }
 0x31d   : > { %v2337_v61 = vpack.c.bf16 (!%p1834_p11), %v1855_v59, %v1854_v58  ;;  %v1857_v63 = vld [vmem:[#allocation3 + $0x98] sm:$0xff] (!%p1834_p11)  ;;  %v1858_v26 = vld [vmem:[#allocation3 + $0xa0] sm:$0xff] (!%p1834_p11)  ;;  %1972 = vst [vmem:[%s3322_s10 + $0x30] sm:$0xff] (!%p1834_p11), %v2335_v56  ;;  %v1859_v0 = vld [vmem:[#allocation3 + $0xa8] sm:$0xff] (!%p1834_p11) }
 0x31e   : > { %v2338_v55 = vpack.c.bf16 %v1857_v63, %v1856_v62  ;;  %v1860_v1 = vld [vmem:[#allocation3 + $0xb0] sm:$0xff]  ;;  %v1861_v21 = vld [vmem:[#allocation3 + $0xb8] sm:$0xff]  ;;  %1973 = vst [vmem:[%s3322_s10 + $0x38] sm:$0xff] %v2336_v60  ;;  %v2339_v2 = vpack.c.bf16 %v1859_v0, %v1858_v26  ;;  %v1862_v28 = vld [vmem:[#allocation3 + $0xc0] sm:$0xff] }
 0x31f   : > { %1974 = vst [vmem:[%s3322_s10 + $0x40] sm:$0xff] %v2337_v61  ;;  %v2340_v3 = vpack.c.bf16 %v1861_v21, %v1860_v1  ;;  %v1863_v4 = vld [vmem:[#allocation3 + $0xc8] sm:$0xff]  ;;  %v1864_v5 = vld [vmem:[#allocation3 + $0xd0] sm:$0xff]  ;;  %v1865_v7 = vld [vmem:[#allocation3 + $0xd8] sm:$0xff] }
 0x320   : > { %1975 = vst [vmem:[%s3322_s10 + $0x48] sm:$0xff] %v2338_v55  ;;  %v2341_v6 = vpack.c.bf16 %v1863_v4, %v1862_v28  ;;  %v1866_v27 = vld [vmem:[#allocation3 + $0xe0] sm:$0xff]  ;;  %v1867_v32 = vld [vmem:[#allocation3 + $0xe8] sm:$0xff]  ;;  %1976 = vst [vmem:[%s3322_s10 + $0x50] sm:$0xff] %v2339_v2  ;;  %v2342_v34 = vpack.c.bf16 %v1865_v7, %v1864_v5 }
 0x321   : > { %1977 = vst [vmem:[%s3322_s10 + $0x58] sm:$0xff] %v2340_v3  ;;  %v2343_v8 = vpack.c.bf16 %v1867_v32, %v1866_v27  ;;  %v1868_v9 = vld [vmem:[#allocation3 + $0xf0] sm:$0xff]  ;;  %v1869_v33 = vld [vmem:[#allocation3 + $0xf8] sm:$0xff] }
 0x322   : > { %1978 = vst [vmem:[%s3322_s10 + $0x60] sm:$0xff] %v2341_v6  ;;  %v2344_v10 = vpack.c.bf16 %v1869_v33, %v1868_v9  ;;  %1979 = vst [vmem:[%s3322_s10 + $0x68] sm:$0xff] %v2342_v34 }
 0x323   : > { %1980 = vst [vmem:[%s3322_s10 + $0x70] sm:$0xff] %v2343_v8 }
 0x324   : > { %1981 = vst [vmem:[%s3322_s10 + $0x78] sm:$0xff] %v2344_v10 }
 0x325 PF: > { %s3709_s22 = sld [smem:[#allocation15_spill]]  ;;  %s3710_s11 = sld [smem:[#allocation22_spill]] }
 0x326   : > { %s1997_s23 = sshll.u32 %s3322_s10, 4  ;;  %s3570_s2 = scalar_lea.sflag [#allocation6], %s269_s6  ;;  %s3566_s23 = int_to_ptr.vmem [resolvable:$true] %s1997_s23 }
 0x327   : > { %s2829_s8 = scalar_lea.vmem %s3566_s23, 2048  ;;  %p3711_p3 = scmp.ne.s32.totalorder %s3691_s7, 0 }
 0x328   : > { %p2830_p7 = scmp.ne.s32.totalorder %s3566_s23, %s2829_s8  ;;  %s3004_s21 = smov [#allocation9]  }
 0x329   : > { %s2833_s3 = sshll.u32 %s3004_s21, 4  ;;  %s2834_s3 = int_to_ptr.vmem [resolvable:$false] %s2833_s3 }
 0x32a   : > { %p2831_p4 = pnand %p2830_p7, %p3711_p3  ;;  %s2835_s28 = scalar_lea.vmem %s2834_s3, 4096 }
 0x32b   : > { %s2346_s15 = sshll.u32 %s3709_s22, 11  ;;  %p2836_p8 = scmp.lt.s32.totalorder %s3566_s23, %s2834_s3 }
 0x32c   : > { %s3563_s30 = scalar_lea.hbm %s3710_s11, %s2346_s15  ;;  %p2832_p1 = pneg %p2831_p4 }
 0x32d   : > { %p2837_p6 = scmp.lt.s32.totalorder %s2835_s28, %s2829_s8 }
 0x32f   : > { %p2838_p5 = por %p2837_p6, %p2836_p8 }
 0x331   : > { %p2839_p12 = pnand %p2838_p5, %p2832_p1 }
 0x333   : > { %2842 = shalt.err (!%p2839_p12)
}
 0x334   : > { %s2843_s6 = scalar_lea.hbm %s3563_s30, 2048  ;;  %s2847_s22 = scalar_lea.hbm %s3710_s11, 4096 }
 0x335   : > { %p2844_p13 = scmp.ne.s32.totalorder %s3563_s30, %s2843_s6  ;;  %p2848_p2 = scmp.lt.u32.totalorder %s3563_s30, %s3710_s11 }
 0x336   : > { %p2849_p10 = scmp.lt.u32.totalorder %s2847_s22, %s2843_s6  ;;  %p2851_p7 = scmp.lt.u32.totalorder %s2843_s6, %s3563_s30 }
 0x337   : > { %p2845_p9 = pnand %p2844_p13, %p3711_p3 }
 0x338   : > { %p2850_p11 = por %p2849_p10, %p2848_p2 }
 0x339   : > { %p2846_p0 = pneg %p2845_p9 }
 0x33a   : > { %p2852_p4 = por %p2851_p7, %p2850_p11 }
 0x33c   : > { %p2853_p1 = pnand %p2852_p4, %p2846_p0 }
 0x33e   : > { %2856 = shalt.err (!%p2853_p1)
}
 0x33f   : > { %s3005_s1 = smov 256   ;;  %s3006_s8 = smov 16  }
 0x340   : > { %2351 = dma.vmem_to_hbm [thread:$0]  (%p3711_p3), %s3566_s23, 2048, %s3563_s30, %s3570_s2, %s3005_s1, %s3005_s1, %s3006_s8  }
 0x341 PF: > { %p2365_p8 = scmp.ge.s32.totalorder %s2995_s27, 2  ;;  %s2012_s21 = sand.u32 1, %s2935_s12  }
 0x342   : > { %p3712_p6 = scmp.ne.s32.totalorder %s3692_s0, 0  ;;  %s2013_s3 = scalar_lea.sflag [#allocation6], %s2012_s21 }
 0x344   : > { %p2361_p5 = pnand %p2365_p8, %p3712_p6 }
 0x346   : > { %2930 = dma.done.wait (!%p2361_p5), %s2013_s3, 2048  }
 0x347   : > { %2932 = vsyncadd (!%p2361_p5), %s2013_s3, 4294965248  ;;  %s22_s27 = sadd.s32 1, %s2995_s27   ;;  %s3714_s7 = sld [smem:[#allocation16_spill]] }
 0x348   : > { %p3599_p12 = scmp.ge.s32.totalorder %s22_s27, 10   ;;  %s3715_s0 = sld [smem:[#allocation17_spill]] }
 0x349   : > { %s3716_s30 = sld [smem:[#allocation18_spill]]  ;;  %s3717_s12 = smov %s2939_s13 }
 0x34a   : > { %s3718_s13 = smov %s2943_s14  ;;  %s3719_s14 = smov %s3237_s5 }
 0x34b   : > { %s3720_s15 = smov %s2951_s16  ;;  %s3721_s16 = smov %s2955_s17 }
 0x34c   : > { %s3722_s17 = smov %s3219_s4  ;;  %s3723_s18 = smov %s2963_s19 }
 0x34d   : > { %s3724_s19 = smov %s2967_s20  ;;  %s3725_s20 = smov %s3140_s9 }
 0x34e   : > { %s3726_s21 = smov %s2983_s24  ;;  %s3727_s22 = smov %s2987_s25 }
 0x34f   : > { %s3728_s23 = smov %s2991_s26  ;;  %s3729_s24 = smov %s3714_s7 }
 0x350   : > { %s3730_s25 = smov %s3715_s0  ;;  %s3731_s26 = smov %s3716_s30 }
 0x351   :  { %21 = sbr.rel (!%p3599_p12) target bundleno = 18 (0x12), region = 110 }
 0x358   :  { %2018 = vsyncpa [#allocation5], 1 }
 0x359   :  { %2020 = vsyncpa [#allocation5 + $0x1], 1 }
 0x35a   :  { %2021 = vsyncpa [#allocation8], 1 }
 0x35b   :  { %2023 = vsyncpa [#allocation8 + $0x1], 1 }
 0x35c   :  { %2024 = vsyncpa [#allocation6], 1 }
 0x35d   :  { %2026 = vsyncpa [#allocation6 + $0x1], 1 }

</bundles_post_ra>
